<compile_context>
chip_gen: v7x
topology: tpu7x:2x2x1
jax: 0.10.0
libtpu: 0.0.40
codegen_flags: <defaults>
</compile_context>

<pallas_src>
import functools

import jax
import jax.numpy as jnp
from jax.experimental import pallas as pl
from jax.experimental.pallas import tpu as pltpu


def _fused_recursive_kernel(x_ref, w1_ref, b1_ref, wa_ref, ba_ref, wb_ref,
                            bb_ref, valid_ref, out_ref,
                            pad_ref, patches_ref,
                            *, n_res, ksize, H, W):
    p = ksize // 2
    Wp = W + 2 * p
    HWp = H * Wp                      # flat length of the conv-output layout
    c_in = x_ref.shape[1]
    c_out = out_ref.shape[1]
    interior = p * Wp + p             # flat offset of pixel (0, 0)

    # Zero the flat padded buffer once per image; halo cells are never
    # overwritten with nonzero data afterwards, so it provides SAME zero
    # padding for every conv of the whole recursion.  (Must run every grid
    # step: with dimension_semantics=("parallel",) each core has its own
    # scratch, so do NOT gate this behind program_id == 0.)
    pad_ref[...] = jnp.zeros_like(pad_ref)

    def conv_plus_bias(cin, w_ref, b_ref):
        """Conv + bias over the (already relu'd) contents of pad_ref[0:cin].

        Returns (c_out, H*Wp) f32; columns with (col % Wp) >= W are garbage
        and are masked before any reuse / dropped in the wrapper.
        """
        # im2col: tap (kh, kw) of the row-flattened padded image is one
        # contiguous bf16 lane slice -> K*K VMEM copies build the patch matrix.
        for kh in range(ksize):
            for kw in range(ksize):
                tap = kh * ksize + kw
                off = kh * Wp + kw
                patches_ref[tap * cin:(tap + 1) * cin, :] = (
                    pad_ref[0:cin, off:off + HWp])
        # One bf16 MXU matmul per conv, f32 accumulation.
        y = jnp.dot(w_ref[...], patches_ref[0:ksize * ksize * cin, :],
                    preferred_element_type=jnp.float32)
        return y + b_ref[...]          # bias pre-broadcast to (c_out, HWp)

    # ---- h_0 = conv1(relu(x)) -------------------------------------------
    # Input arrives width-pre-padded (wrap columns already zero), so loading
    # it is a single interior store (no per-row scatter, no mask needed).
    pad_ref[0:c_in, interior:interior + HWp] = (
        jnp.maximum(x_ref[0], 0.0).astype(pad_ref.dtype))
    h0 = conv_plus_bias(c_in, w1_ref, b1_ref)

    # valid-column mask: 1.0 on real pixels, 0.0 on wrap columns.  Loaded ONCE
    # (hoisted out of the recursion; pre-broadcast to (c_out, HWp) in wrapper).
    valid = valid_ref[...]

    def load_activation(act):
        """relu(act) with wrap columns zeroed -> interior of padded buffer."""
        pad_ref[0:c_out, interior:interior + HWp] = (
            (jnp.maximum(act, 0.0) * valid).astype(pad_ref.dtype))

    # ---- n_res residual units with shared weights, fully unrolled ---------
    cur = h0
    for _ in range(n_res):             # n_res is static -> full unroll
        load_activation(cur)
        t = conv_plus_bias(c_out, wa_ref, ba_ref)
        load_activation(t)
        cur = conv_plus_bias(c_out, wb_ref, bb_ref) + h0

    out_ref[0] = cur.astype(out_ref.dtype)


def _flatten_weight(w_hwio):
    """(kh, kw, Cin, Cout) -> (Cout, kh*kw*Cin) in (kh, kw, cin) column order."""
    kh, kw, cin, cout = w_hwio.shape
    return jnp.transpose(w_hwio, (3, 0, 1, 2)).reshape(cout, kh * kw * cin)


def recursive_block_forward(x_nchw, params, n_res, ksize):
    """JAX/Pallas equivalent of RecursiveBlock.forward (NCHW in / NCHW out)."""
    N, Cin, H, W = x_nchw.shape
    Cout = params["w1"].shape[3]
    p = ksize // 2
    Hp, Wp = H + 2 * p, W + 2 * p
    HWp = H * Wp
    Cmax = max(Cin, Cout)
    # Padded-buffer length: covers every tap slice (Hp*Wp + 2p), rounded up to
    # a lane-dense multiple of 128.
    flat_len = ((Hp * Wp + 2 * p + 127) // 128) * 128

    # Width-pre-padded, row-flattened input (wrap columns arrive as zeros).
    x_pad = jnp.pad(x_nchw.astype(jnp.float32),
                    ((0, 0), (0, 0), (0, 0), (0, 2 * p)))
    x2 = x_pad.reshape(N, Cin, HWp)

    # bf16 MXU operands; accumulation stays f32 inside the kernel.
    w1 = _flatten_weight(params["w1"]).astype(jnp.bfloat16)
    wa = _flatten_weight(params["wa"]).astype(jnp.bfloat16)
    wb = _flatten_weight(params["wb"]).astype(jnp.bfloat16)

    # Biases and valid-column mask pre-broadcast to full lane width so the
    # kernel never re-materializes a broadcast inside the recursion.
    def _bcast(b):
        return jnp.broadcast_to(b.astype(jnp.float32)[:, None], (Cout, HWp))

    b1, ba, bb = _bcast(params["b1"]), _bcast(params["ba"]), _bcast(params["bb"])
    valid = jnp.broadcast_to(
        (jnp.arange(HWp, dtype=jnp.int32) % Wp < W).astype(jnp.float32)[None, :],
        (Cout, HWp))

    kernel = functools.partial(_fused_recursive_kernel,
                               n_res=n_res, ksize=ksize, H=H, W=W)

    # NOTE: on single-TensorCore v5e/v6e, folding the batch into the lane axis
    # (grid=(1,), layout (C, N*H*Wp)) would save ~0.35us/image of grid-step
    # overhead; kept per-image + "parallel" so v7x's two TCs each take an image.
    out_flat = pl.pallas_call(
        kernel,
        out_shape=jax.ShapeDtypeStruct((N, Cout, HWp), jnp.float32),
        grid_spec=pltpu.PrefetchScalarGridSpec(
            num_scalar_prefetch=0,
            grid=(N,),
            in_specs=[
                pl.BlockSpec((1, Cin, HWp), lambda n: (n, 0, 0)),              # x
                pl.BlockSpec((Cout, ksize * ksize * Cin), lambda n: (0, 0)),   # w1
                pl.BlockSpec((Cout, HWp), lambda n: (0, 0)),                   # b1
                pl.BlockSpec((Cout, ksize * ksize * Cout), lambda n: (0, 0)),  # wa
                pl.BlockSpec((Cout, HWp), lambda n: (0, 0)),                   # ba
                pl.BlockSpec((Cout, ksize * ksize * Cout), lambda n: (0, 0)),  # wb
                pl.BlockSpec((Cout, HWp), lambda n: (0, 0)),                   # bb
                pl.BlockSpec((Cout, HWp), lambda n: (0, 0)),                   # valid
            ],
            out_specs=pl.BlockSpec((1, Cout, HWp), lambda n: (n, 0, 0)),
            scratch_shapes=[
                pltpu.VMEM((Cmax, flat_len), jnp.bfloat16),                # padded act
                pltpu.VMEM((ksize * ksize * Cmax, HWp), jnp.bfloat16),     # im2col
            ],
        ),
        compiler_params=pltpu.CompilerParams(
            dimension_semantics=("parallel",)),
    )(x2, w1, b1, wa, ba, wb, bb, valid)

    # Drop the Wp-W wrap columns and recover NCHW -- cheap XLA reshape + slice.
    return out_flat.reshape(N, Cout, H, Wp)[:, :, :, :W]


# ---------------- pure-JAX f32 reference (for correctness check only) -------
def _ref_relu_conv(x_nhwc, w_hwio, b, p):
    y = jax.lax.conv_general_dilated(
        jnp.maximum(x_nhwc, 0.0), w_hwio, window_strides=(1, 1),
        padding=((p, p), (p, p)),
        dimension_numbers=("NHWC", "HWIO", "NHWC"))
    return y + b[None, None, None, :]


def _ref_forward(x_nchw, params, n_res, ksize):
    p = ksize // 2
    x = jnp.transpose(x_nchw, (0, 2, 3, 1))
    h0 = _ref_relu_conv(x, params["w1"], params["b1"], p)
    cur = h0
    for _ in range(n_res):
        t = _ref_relu_conv(cur, params["wa"], params["ba"], p)
        cur = _ref_relu_conv(t, params["wb"], params["bb"], p) + h0
    return jnp.transpose(cur, (0, 3, 1, 2))


if __name__ == "__main__":
    # Module config: RecursiveBlock(n_res=3, input_nc=4, ngf=8, ksize=3)
    n_res, input_nc, ngf, ksize = 3, 4, 8, 3
    N, H, W = 2, 16, 16

    key = jax.random.PRNGKey(0)
    k_x, k_w1, k_b1, k_wa, k_ba, k_wb, k_bb = jax.random.split(key, 7)

    x = jax.random.normal(k_x, (N, input_nc, H, W), jnp.float32)

    # Conv weights stored HWIO = (kh, kw, Cin, Cout).
    params = {
        "w1": 0.1 * jax.random.normal(k_w1, (ksize, ksize, input_nc, ngf), jnp.float32),
        "b1": 0.1 * jax.random.normal(k_b1, (ngf,), jnp.float32),
        "wa": 0.1 * jax.random.normal(k_wa, (ksize, ksize, ngf, ngf), jnp.float32),
        "ba": 0.1 * jax.random.normal(k_ba, (ngf,), jnp.float32),
        "wb": 0.1 * jax.random.normal(k_wb, (ksize, ksize, ngf, ngf), jnp.float32),
        "bb": 0.1 * jax.random.normal(k_bb, (ngf,), jnp.float32),
    }

    fwd = jax.jit(recursive_block_forward, static_argnums=(2, 3))
    out = jax.block_until_ready(fwd(x, params, n_res, ksize))

    ref = jax.block_until_ready(_ref_forward(x, params, n_res, ksize))
    assert out.shape == (N, ngf, H, W), out.shape
    # bf16 MXU operands (f32 accumulation) -> ~1e-2-level agreement vs the
    # pure-f32 reference; tolerance loosened accordingly.
    assert jnp.allclose(out, ref, rtol=5e-2, atol=5e-2), float(
        jnp.max(jnp.abs(out - ref)))

    print("KERNEL_OK")
</pallas_src>

<mosaic_0001>
module attributes {stable_mosaic.version = 11 : i64} {
  func.func @_fused_recursive_kernel(%arg0: i32, %arg1: memref<1x4x288xf32, #tpu.memory_space<vmem>>, %arg2: memref<8x36xbf16, #tpu.memory_space<vmem>>, %arg3: memref<8x288xf32, #tpu.memory_space<vmem>>, %arg4: memref<8x72xbf16, #tpu.memory_space<vmem>>, %arg5: memref<8x288xf32, #tpu.memory_space<vmem>>, %arg6: memref<8x72xbf16, #tpu.memory_space<vmem>>, %arg7: memref<8x288xf32, #tpu.memory_space<vmem>>, %arg8: memref<8x288xf32, #tpu.memory_space<vmem>>, %arg9: memref<1x8x288xf32, #tpu.memory_space<vmem>>, %arg10: memref<8x384xbf16, #tpu.memory_space<vmem>>, %arg11: memref<72x288xbf16, #tpu.memory_space<vmem>>) attributes {dimension_semantics = [#tpu.dimension_semantics<parallel>], iteration_bounds = array<i64: 2>, scalar_prefetch = 0 : i64, scratch_operands = 2 : i64, tpu.core_type = #tpu.core_type<tc>, window_params = [{transform_indices = @transform_0, window_bounds = array<i64: 1, 4, 288>}, {pipeline_mode = #tpu.pipeline_mode<synchronous>, transform_indices = @transform_1, window_bounds = array<i64: 8, 36>}, {pipeline_mode = #tpu.pipeline_mode<synchronous>, transform_indices = @transform_2, window_bounds = array<i64: 8, 288>}, {pipeline_mode = #tpu.pipeline_mode<synchronous>, transform_indices = @transform_3, window_bounds = array<i64: 8, 72>}, {pipeline_mode = #tpu.pipeline_mode<synchronous>, transform_indices = @transform_4, window_bounds = array<i64: 8, 288>}, {pipeline_mode = #tpu.pipeline_mode<synchronous>, transform_indices = @transform_5, window_bounds = array<i64: 8, 72>}, {pipeline_mode = #tpu.pipeline_mode<synchronous>, transform_indices = @transform_6, window_bounds = array<i64: 8, 288>}, {pipeline_mode = #tpu.pipeline_mode<synchronous>, transform_indices = @transform_7, window_bounds = array<i64: 8, 288>}, {transform_indices = @transform_8, window_bounds = array<i64: 1, 8, 288>}]} {
    %cst = arith.constant 0.000000e+00 : bf16
    %0 = vector.broadcast %cst : bf16 to vector<8x384xbf16>
    %c0 = arith.constant 0 : index
    %c0_0 = arith.constant 0 : index
    %1 = vector.load %arg10[%c0, %c0_0] : memref<8x384xbf16, #tpu.memory_space<vmem>>, vector<8x384xbf16>
    tpu.vector_store %arg10[%c0, %c0_0], %0 {strides = array<i32>} : memref<8x384xbf16, #tpu.memory_space<vmem>>, vector<8x384xbf16>,
    %c0_1 = arith.constant 0 : index
    %c0_2 = arith.constant 0 : index
    %c0_3 = arith.constant 0 : index
    %2 = vector.load %arg1[%c0_1, %c0_2, %c0_3] : memref<1x4x288xf32, #tpu.memory_space<vmem>>, vector<1x4x288xf32>
    %3 = vector.shape_cast %2 : vector<1x4x288xf32> to vector<4x288xf32>
    %cst_4 = arith.constant 0.000000e+00 : f32
    %4 = vector.broadcast %cst_4 : f32 to vector<4x288xf32>
    %5 = arith.maximumf %3, %4 : vector<4x288xf32>
    %6 = arith.truncf %5 : vector<4x288xf32> to vector<4x288xbf16>
    %c0_5 = arith.constant 0 : index
    %c19 = arith.constant 19 : index
    %7 = vector.load %arg10[%c0_5, %c19] : memref<8x384xbf16, #tpu.memory_space<vmem>>, vector<4x288xbf16>
    tpu.vector_store %arg10[%c0_5, %c19], %6 {strides = array<i32>} : memref<8x384xbf16, #tpu.memory_space<vmem>>, vector<4x288xbf16>,
    %c0_6 = arith.constant 0 : index
    %c0_7 = arith.constant 0 : index
    %8 = vector.load %arg10[%c0_6, %c0_7] : memref<8x384xbf16, #tpu.memory_space<vmem>>, vector<4x288xbf16>
    %c0_8 = arith.constant 0 : index
    %c0_9 = arith.constant 0 : index
    %9 = vector.load %arg11[%c0_8, %c0_9] : memref<72x288xbf16, #tpu.memory_space<vmem>>, vector<4x288xbf16>
    tpu.vector_store %arg11[%c0_8, %c0_9], %8 {strides = array<i32>} : memref<72x288xbf16, #tpu.memory_space<vmem>>, vector<4x288xbf16>,
    %c0_10 = arith.constant 0 : index
    %c1 = arith.constant 1 : index
    %10 = vector.load %arg10[%c0_10, %c1] : memref<8x384xbf16, #tpu.memory_space<vmem>>, vector<4x288xbf16>
    %c4 = arith.constant 4 : index
    %c0_11 = arith.constant 0 : index
    %11 = vector.load %arg11[%c4, %c0_11] : memref<72x288xbf16, #tpu.memory_space<vmem>>, vector<4x288xbf16>
    tpu.vector_store %arg11[%c4, %c0_11], %10 {strides = array<i32>} : memref<72x288xbf16, #tpu.memory_space<vmem>>, vector<4x288xbf16>,
    %c0_12 = arith.constant 0 : index
    %c2 = arith.constant 2 : index
    %12 = vector.load %arg10[%c0_12, %c2] : memref<8x384xbf16, #tpu.memory_space<vmem>>, vector<4x288xbf16>
    %c8 = arith.constant 8 : index
    %c0_13 = arith.constant 0 : index
    %13 = vector.load %arg11[%c8, %c0_13] : memref<72x288xbf16, #tpu.memory_space<vmem>>, vector<4x288xbf16>
    tpu.vector_store %arg11[%c8, %c0_13], %12 {strides = array<i32>} : memref<72x288xbf16, #tpu.memory_space<vmem>>, vector<4x288xbf16>,
    %c0_14 = arith.constant 0 : index
    %c18 = arith.constant 18 : index
    %14 = vector.load %arg10[%c0_14, %c18] : memref<8x384xbf16, #tpu.memory_space<vmem>>, vector<4x288xbf16>
    %c12 = arith.constant 12 : index
    %c0_15 = arith.constant 0 : index
    %15 = vector.load %arg11[%c12, %c0_15] : memref<72x288xbf16, #tpu.memory_space<vmem>>, vector<4x288xbf16>
    tpu.vector_store %arg11[%c12, %c0_15], %14 {strides = array<i32>} : memref<72x288xbf16, #tpu.memory_space<vmem>>, vector<4x288xbf16>,
    %c0_16 = arith.constant 0 : index
    %c19_17 = arith.constant 19 : index
    %16 = vector.load %arg10[%c0_16, %c19_17] : memref<8x384xbf16, #tpu.memory_space<vmem>>, vector<4x288xbf16>
    %c16 = arith.constant 16 : index
    %c0_18 = arith.constant 0 : index
    %17 = vector.load %arg11[%c16, %c0_18] : memref<72x288xbf16, #tpu.memory_space<vmem>>, vector<4x288xbf16>
    tpu.vector_store %arg11[%c16, %c0_18], %16 {strides = array<i32>} : memref<72x288xbf16, #tpu.memory_space<vmem>>, vector<4x288xbf16>,
    %c0_19 = arith.constant 0 : index
    %c20 = arith.constant 20 : index
    %18 = vector.load %arg10[%c0_19, %c20] : memref<8x384xbf16, #tpu.memory_space<vmem>>, vector<4x288xbf16>
    %c20_20 = arith.constant 20 : index
    %c0_21 = arith.constant 0 : index
    %19 = vector.load %arg11[%c20_20, %c0_21] : memref<72x288xbf16, #tpu.memory_space<vmem>>, vector<4x288xbf16>
    tpu.vector_store %arg11[%c20_20, %c0_21], %18 {strides = array<i32>} : memref<72x288xbf16, #tpu.memory_space<vmem>>, vector<4x288xbf16>,
    %c0_22 = arith.constant 0 : index
    %c36 = arith.constant 36 : index
    %20 = vector.load %arg10[%c0_22, %c36] : memref<8x384xbf16, #tpu.memory_space<vmem>>, vector<4x288xbf16>
    %c24 = arith.constant 24 : index
    %c0_23 = arith.constant 0 : index
    %21 = vector.load %arg11[%c24, %c0_23] : memref<72x288xbf16, #tpu.memory_space<vmem>>, vector<4x288xbf16>
    tpu.vector_store %arg11[%c24, %c0_23], %20 {strides = array<i32>} : memref<72x288xbf16, #tpu.memory_space<vmem>>, vector<4x288xbf16>,
    %c0_24 = arith.constant 0 : index
    %c37 = arith.constant 37 : index
    %22 = vector.load %arg10[%c0_24, %c37] : memref<8x384xbf16, #tpu.memory_space<vmem>>, vector<4x288xbf16>
    %c28 = arith.constant 28 : index
    %c0_25 = arith.constant 0 : index
    %23 = vector.load %arg11[%c28, %c0_25] : memref<72x288xbf16, #tpu.memory_space<vmem>>, vector<4x288xbf16>
    tpu.vector_store %arg11[%c28, %c0_25], %22 {strides = array<i32>} : memref<72x288xbf16, #tpu.memory_space<vmem>>, vector<4x288xbf16>,
    %c0_26 = arith.constant 0 : index
    %c38 = arith.constant 38 : index
    %24 = vector.load %arg10[%c0_26, %c38] : memref<8x384xbf16, #tpu.memory_space<vmem>>, vector<4x288xbf16>
    %c32 = arith.constant 32 : index
    %c0_27 = arith.constant 0 : index
    %25 = vector.load %arg11[%c32, %c0_27] : memref<72x288xbf16, #tpu.memory_space<vmem>>, vector<4x288xbf16>
    tpu.vector_store %arg11[%c32, %c0_27], %24 {strides = array<i32>} : memref<72x288xbf16, #tpu.memory_space<vmem>>, vector<4x288xbf16>,
    %c0_28 = arith.constant 0 : index
    %c0_29 = arith.constant 0 : index
    %26 = vector.load %arg2[%c0_28, %c0_29] : memref<8x36xbf16, #tpu.memory_space<vmem>>, vector<8x36xbf16>
    %c0_30 = arith.constant 0 : index
    %c0_31 = arith.constant 0 : index
    %27 = vector.load %arg11[%c0_30, %c0_31] : memref<72x288xbf16, #tpu.memory_space<vmem>>, vector<36x288xbf16>
    %cst_32 = arith.constant dense<0.000000e+00> : vector<8x288xf32>
    %28 = tpu.matmul %26, %27, %cst_32 {dimension_numbers = #tpu.dot_dimension_numbers<[1], [0], [0], [1], [0, 0, 1, 1], [], []>} : vector<8x36xbf16>, vector<36x288xbf16>, vector<8x288xf32> -> vector<8x288xf32>
    %c0_33 = arith.constant 0 : index
    %c0_34 = arith.constant 0 : index
    %29 = vector.load %arg3[%c0_33, %c0_34] : memref<8x288xf32, #tpu.memory_space<vmem>>, vector<8x288xf32>
    %30 = arith.addf %28, %29 : vector<8x288xf32>
    %c0_35 = arith.constant 0 : index
    %c0_36 = arith.constant 0 : index
    %31 = vector.load %arg8[%c0_35, %c0_36] : memref<8x288xf32, #tpu.memory_space<vmem>>, vector<8x288xf32>
    %cst_37 = arith.constant 0.000000e+00 : f32
    %32 = vector.broadcast %cst_37 : f32 to vector<8x288xf32>
    %33 = arith.maximumf %30, %32 : vector<8x288xf32>
    %34 = arith.mulf %33, %31 : vector<8x288xf32>
    %35 = arith.truncf %34 : vector<8x288xf32> to vector<8x288xbf16>
    %c0_38 = arith.constant 0 : index
    %c19_39 = arith.constant 19 : index
    %36 = vector.load %arg10[%c0_38, %c19_39] : memref<8x384xbf16, #tpu.memory_space<vmem>>, vector<8x288xbf16>
    tpu.vector_store %arg10[%c0_38, %c19_39], %35 {strides = array<i32>} : memref<8x384xbf16, #tpu.memory_space<vmem>>, vector<8x288xbf16>,
    %c0_40 = arith.constant 0 : index
    %c0_41 = arith.constant 0 : index
    %37 = vector.load %arg10[%c0_40, %c0_41] : memref<8x384xbf16, #tpu.memory_space<vmem>>, vector<8x288xbf16>
    %c0_42 = arith.constant 0 : index
    %c0_43 = arith.constant 0 : index
    %38 = vector.load %arg11[%c0_42, %c0_43] : memref<72x288xbf16, #tpu.memory_space<vmem>>, vector<8x288xbf16>
    tpu.vector_store %arg11[%c0_42, %c0_43], %37 {strides = array<i32>} : memref<72x288xbf16, #tpu.memory_space<vmem>>, vector<8x288xbf16>,
    %c0_44 = arith.constant 0 : index
    %c1_45 = arith.constant 1 : index
    %39 = vector.load %arg10[%c0_44, %c1_45] : memref<8x384xbf16, #tpu.memory_space<vmem>>, vector<8x288xbf16>
    %c8_46 = arith.constant 8 : index
    %c0_47 = arith.constant 0 : index
    %40 = vector.load %arg11[%c8_46, %c0_47] : memref<72x288xbf16, #tpu.memory_space<vmem>>, vector<8x288xbf16>
    tpu.vector_store %arg11[%c8_46, %c0_47], %39 {strides = array<i32>} : memref<72x288xbf16, #tpu.memory_space<vmem>>, vector<8x288xbf16>,
    %c0_48 = arith.constant 0 : index
    %c2_49 = arith.constant 2 : index
    %41 = vector.load %arg10[%c0_48, %c2_49] : memref<8x384xbf16, #tpu.memory_space<vmem>>, vector<8x288xbf16>
    %c16_50 = arith.constant 16 : index
    %c0_51 = arith.constant 0 : index
    %42 = vector.load %arg11[%c16_50, %c0_51] : memref<72x288xbf16, #tpu.memory_space<vmem>>, vector<8x288xbf16>
    tpu.vector_store %arg11[%c16_50, %c0_51], %41 {strides = array<i32>} : memref<72x288xbf16, #tpu.memory_space<vmem>>, vector<8x288xbf16>,
    %c0_52 = arith.constant 0 : index
    %c18_53 = arith.constant 18 : index
    %43 = vector.load %arg10[%c0_52, %c18_53] : memref<8x384xbf16, #tpu.memory_space<vmem>>, vector<8x288xbf16>
    %c24_54 = arith.constant 24 : index
    %c0_55 = arith.constant 0 : index
    %44 = vector.load %arg11[%c24_54, %c0_55] : memref<72x288xbf16, #tpu.memory_space<vmem>>, vector<8x288xbf16>
    tpu.vector_store %arg11[%c24_54, %c0_55], %43 {strides = array<i32>} : memref<72x288xbf16, #tpu.memory_space<vmem>>, vector<8x288xbf16>,
    %c0_56 = arith.constant 0 : index
    %c19_57 = arith.constant 19 : index
    %45 = vector.load %arg10[%c0_56, %c19_57] : memref<8x384xbf16, #tpu.memory_space<vmem>>, vector<8x288xbf16>
    %c32_58 = arith.constant 32 : index
    %c0_59 = arith.constant 0 : index
    %46 = vector.load %arg11[%c32_58, %c0_59] : memref<72x288xbf16, #tpu.memory_space<vmem>>, vector<8x288xbf16>
    tpu.vector_store %arg11[%c32_58, %c0_59], %45 {strides = array<i32>} : memref<72x288xbf16, #tpu.memory_space<vmem>>, vector<8x288xbf16>,
    %c0_60 = arith.constant 0 : index
    %c20_61 = arith.constant 20 : index
    %47 = vector.load %arg10[%c0_60, %c20_61] : memref<8x384xbf16, #tpu.memory_space<vmem>>, vector<8x288xbf16>
    %c40 = arith.constant 40 : index
    %c0_62 = arith.constant 0 : index
    %48 = vector.load %arg11[%c40, %c0_62] : memref<72x288xbf16, #tpu.memory_space<vmem>>, vector<8x288xbf16>
    tpu.vector_store %arg11[%c40, %c0_62], %47 {strides = array<i32>} : memref<72x288xbf16, #tpu.memory_space<vmem>>, vector<8x288xbf16>,
    %c0_63 = arith.constant 0 : index
    %c36_64 = arith.constant 36 : index
    %49 = vector.load %arg10[%c0_63, %c36_64] : memref<8x384xbf16, #tpu.memory_space<vmem>>, vector<8x288xbf16>
    %c48 = arith.constant 48 : index
    %c0_65 = arith.constant 0 : index
    %50 = vector.load %arg11[%c48, %c0_65] : memref<72x288xbf16, #tpu.memory_space<vmem>>, vector<8x288xbf16>
    tpu.vector_store %arg11[%c48, %c0_65], %49 {strides = array<i32>} : memref<72x288xbf16, #tpu.memory_space<vmem>>, vector<8x288xbf16>,
    %c0_66 = arith.constant 0 : index
    %c37_67 = arith.constant 37 : index
    %51 = vector.load %arg10[%c0_66, %c37_67] : memref<8x384xbf16, #tpu.memory_space<vmem>>, vector<8x288xbf16>
    %c56 = arith.constant 56 : index
    %c0_68 = arith.constant 0 : index
    %52 = vector.load %arg11[%c56, %c0_68] : memref<72x288xbf16, #tpu.memory_space<vmem>>, vector<8x288xbf16>
    tpu.vector_store %arg11[%c56, %c0_68], %51 {strides = array<i32>} : memref<72x288xbf16, #tpu.memory_space<vmem>>, vector<8x288xbf16>,
    %c0_69 = arith.constant 0 : index
    %c38_70 = arith.constant 38 : index
    %53 = vector.load %arg10[%c0_69, %c38_70] : memref<8x384xbf16, #tpu.memory_space<vmem>>, vector<8x288xbf16>
    %c64 = arith.constant 64 : index
    %c0_71 = arith.constant 0 : index
    %54 = vector.load %arg11[%c64, %c0_71] : memref<72x288xbf16, #tpu.memory_space<vmem>>, vector<8x288xbf16>
    tpu.vector_store %arg11[%c64, %c0_71], %53 {strides = array<i32>} : memref<72x288xbf16, #tpu.memory_space<vmem>>, vector<8x288xbf16>,
    %c0_72 = arith.constant 0 : index
    %c0_73 = arith.constant 0 : index
    %55 = vector.load %arg4[%c0_72, %c0_73] : memref<8x72xbf16, #tpu.memory_space<vmem>>, vector<8x72xbf16>
    %c0_74 = arith.constant 0 : index
    %c0_75 = arith.constant 0 : index
    %56 = vector.load %arg11[%c0_74, %c0_75] : memref<72x288xbf16, #tpu.memory_space<vmem>>, vector<72x288xbf16>
    %cst_76 = arith.constant dense<0.000000e+00> : vector<8x288xf32>
    %57 = tpu.matmul %55, %56, %cst_76 {dimension_numbers = #tpu.dot_dimension_numbers<[1], [0], [0], [1], [0, 0, 1, 1], [], []>} : vector<8x72xbf16>, vector<72x288xbf16>, vector<8x288xf32> -> vector<8x288xf32>
    %c0_77 = arith.constant 0 : index
    %c0_78 = arith.constant 0 : index
    %58 = vector.load %arg5[%c0_77, %c0_78] : memref<8x288xf32, #tpu.memory_space<vmem>>, vector<8x288xf32>
    %59 = arith.addf %57, %58 : vector<8x288xf32>
    %cst_79 = arith.constant 0.000000e+00 : f32
    %60 = vector.broadcast %cst_79 : f32 to vector<8x288xf32>
    %61 = arith.maximumf %59, %60 : vector<8x288xf32>
    %62 = arith.mulf %61, %31 : vector<8x288xf32>
    %63 = arith.truncf %62 : vector<8x288xf32> to vector<8x288xbf16>
    %c0_80 = arith.constant 0 : index
    %c19_81 = arith.constant 19 : index
    %64 = vector.load %arg10[%c0_80, %c19_81] : memref<8x384xbf16, #tpu.memory_space<vmem>>, vector<8x288xbf16>
    tpu.vector_store %arg10[%c0_80, %c19_81], %63 {strides = array<i32>} : memref<8x384xbf16, #tpu.memory_space<vmem>>, vector<8x288xbf16>,
    %c0_82 = arith.constant 0 : index
    %c0_83 = arith.constant 0 : index
    %65 = vector.load %arg10[%c0_82, %c0_83] : memref<8x384xbf16, #tpu.memory_space<vmem>>, vector<8x288xbf16>
    %c0_84 = arith.constant 0 : index
    %c0_85 = arith.constant 0 : index
    %66 = vector.load %arg11[%c0_84, %c0_85] : memref<72x288xbf16, #tpu.memory_space<vmem>>, vector<8x288xbf16>
    tpu.vector_store %arg11[%c0_84, %c0_85], %65 {strides = array<i32>} : memref<72x288xbf16, #tpu.memory_space<vmem>>, vector<8x288xbf16>,
    %c0_86 = arith.constant 0 : index
    %c1_87 = arith.constant 1 : index
    %67 = vector.load %arg10[%c0_86, %c1_87] : memref<8x384xbf16, #tpu.memory_space<vmem>>, vector<8x288xbf16>
    %c8_88 = arith.constant 8 : index
    %c0_89 = arith.constant 0 : index
    %68 = vector.load %arg11[%c8_88, %c0_89] : memref<72x288xbf16, #tpu.memory_space<vmem>>, vector<8x288xbf16>
    tpu.vector_store %arg11[%c8_88, %c0_89], %67 {strides = array<i32>} : memref<72x288xbf16, #tpu.memory_space<vmem>>, vector<8x288xbf16>,
    %c0_90 = arith.constant 0 : index
    %c2_91 = arith.constant 2 : index
    %69 = vector.load %arg10[%c0_90, %c2_91] : memref<8x384xbf16, #tpu.memory_space<vmem>>, vector<8x288xbf16>
    %c16_92 = arith.constant 16 : index
    %c0_93 = arith.constant 0 : index
    %70 = vector.load %arg11[%c16_92, %c0_93] : memref<72x288xbf16, #tpu.memory_space<vmem>>, vector<8x288xbf16>
    tpu.vector_store %arg11[%c16_92, %c0_93], %69 {strides = array<i32>} : memref<72x288xbf16, #tpu.memory_space<vmem>>, vector<8x288xbf16>,
    %c0_94 = arith.constant 0 : index
    %c18_95 = arith.constant 18 : index
    %71 = vector.load %arg10[%c0_94, %c18_95] : memref<8x384xbf16, #tpu.memory_space<vmem>>, vector<8x288xbf16>
    %c24_96 = arith.constant 24 : index
    %c0_97 = arith.constant 0 : index
    %72 = vector.load %arg11[%c24_96, %c0_97] : memref<72x288xbf16, #tpu.memory_space<vmem>>, vector<8x288xbf16>
    tpu.vector_store %arg11[%c24_96, %c0_97], %71 {strides = array<i32>} : memref<72x288xbf16, #tpu.memory_space<vmem>>, vector<8x288xbf16>,
    %c0_98 = arith.constant 0 : index
    %c19_99 = arith.constant 19 : index
    %73 = vector.load %arg10[%c0_98, %c19_99] : memref<8x384xbf16, #tpu.memory_space<vmem>>, vector<8x288xbf16>
    %c32_100 = arith.constant 32 : index
    %c0_101 = arith.constant 0 : index
    %74 = vector.load %arg11[%c32_100, %c0_101] : memref<72x288xbf16, #tpu.memory_space<vmem>>, vector<8x288xbf16>
    tpu.vector_store %arg11[%c32_100, %c0_101], %73 {strides = array<i32>} : memref<72x288xbf16, #tpu.memory_space<vmem>>, vector<8x288xbf16>,
    %c0_102 = arith.constant 0 : index
    %c20_103 = arith.constant 20 : index
    %75 = vector.load %arg10[%c0_102, %c20_103] : memref<8x384xbf16, #tpu.memory_space<vmem>>, vector<8x288xbf16>
    %c40_104 = arith.constant 40 : index
    %c0_105 = arith.constant 0 : index
    %76 = vector.load %arg11[%c40_104, %c0_105] : memref<72x288xbf16, #tpu.memory_space<vmem>>, vector<8x288xbf16>
    tpu.vector_store %arg11[%c40_104, %c0_105], %75 {strides = array<i32>} : memref<72x288xbf16, #tpu.memory_space<vmem>>, vector<8x288xbf16>,
    %c0_106 = arith.constant 0 : index
    %c36_107 = arith.constant 36 : index
    %77 = vector.load %arg10[%c0_106, %c36_107] : memref<8x384xbf16, #tpu.memory_space<vmem>>, vector<8x288xbf16>
    %c48_108 = arith.constant 48 : index
    %c0_109 = arith.constant 0 : index
    %78 = vector.load %arg11[%c48_108, %c0_109] : memref<72x288xbf16, #tpu.memory_space<vmem>>, vector<8x288xbf16>
    tpu.vector_store %arg11[%c48_108, %c0_109], %77 {strides = array<i32>} : memref<72x288xbf16, #tpu.memory_space<vmem>>, vector<8x288xbf16>,
    %c0_110 = arith.constant 0 : index
    %c37_111 = arith.constant 37 : index
    %79 = vector.load %arg10[%c0_110, %c37_111] : memref<8x384xbf16, #tpu.memory_space<vmem>>, vector<8x288xbf16>
    %c56_112 = arith.constant 56 : index
    %c0_113 = arith.constant 0 : index
    %80 = vector.load %arg11[%c56_112, %c0_113] : memref<72x288xbf16, #tpu.memory_space<vmem>>, vector<8x288xbf16>
    tpu.vector_store %arg11[%c56_112, %c0_113], %79 {strides = array<i32>} : memref<72x288xbf16, #tpu.memory_space<vmem>>, vector<8x288xbf16>,
    %c0_114 = arith.constant 0 : index
    %c38_115 = arith.constant 38 : index
    %81 = vector.load %arg10[%c0_114, %c38_115] : memref<8x384xbf16, #tpu.memory_space<vmem>>, vector<8x288xbf16>
    %c64_116 = arith.constant 64 : index
    %c0_117 = arith.constant 0 : index
    %82 = vector.load %arg11[%c64_116, %c0_117] : memref<72x288xbf16, #tpu.memory_space<vmem>>, vector<8x288xbf16>
    tpu.vector_store %arg11[%c64_116, %c0_117], %81 {strides = array<i32>} : memref<72x288xbf16, #tpu.memory_space<vmem>>, vector<8x288xbf16>,
    %c0_118 = arith.constant 0 : index
    %c0_119 = arith.constant 0 : index
    %83 = vector.load %arg6[%c0_118, %c0_119] : memref<8x72xbf16, #tpu.memory_space<vmem>>, vector<8x72xbf16>
    %c0_120 = arith.constant 0 : index
    %c0_121 = arith.constant 0 : index
    %84 = vector.load %arg11[%c0_120, %c0_121] : memref<72x288xbf16, #tpu.memory_space<vmem>>, vector<72x288xbf16>
    %cst_122 = arith.constant dense<0.000000e+00> : vector<8x288xf32>
    %85 = tpu.matmul %83, %84, %cst_122 {dimension_numbers = #tpu.dot_dimension_numbers<[1], [0], [0], [1], [0, 0, 1, 1], [], []>} : vector<8x72xbf16>, vector<72x288xbf16>, vector<8x288xf32> -> vector<8x288xf32>
    %c0_123 = arith.constant 0 : index
    %c0_124 = arith.constant 0 : index
    %86 = vector.load %arg7[%c0_123, %c0_124] : memref<8x288xf32, #tpu.memory_space<vmem>>, vector<8x288xf32>
    %87 = arith.addf %85, %86 : vector<8x288xf32>
    %88 = arith.addf %87, %30 : vector<8x288xf32>
    %cst_125 = arith.constant 0.000000e+00 : f32
    %89 = vector.broadcast %cst_125 : f32 to vector<8x288xf32>
    %90 = arith.maximumf %88, %89 : vector<8x288xf32>
    %91 = arith.mulf %90, %31 : vector<8x288xf32>
    %92 = arith.truncf %91 : vector<8x288xf32> to vector<8x288xbf16>
    %c0_126 = arith.constant 0 : index
    %c19_127 = arith.constant 19 : index
    %93 = vector.load %arg10[%c0_126, %c19_127] : memref<8x384xbf16, #tpu.memory_space<vmem>>, vector<8x288xbf16>
    tpu.vector_store %arg10[%c0_126, %c19_127], %92 {strides = array<i32>} : memref<8x384xbf16, #tpu.memory_space<vmem>>, vector<8x288xbf16>,
    %c0_128 = arith.constant 0 : index
    %c0_129 = arith.constant 0 : index
    %94 = vector.load %arg10[%c0_128, %c0_129] : memref<8x384xbf16, #tpu.memory_space<vmem>>, vector<8x288xbf16>
    %c0_130 = arith.constant 0 : index
    %c0_131 = arith.constant 0 : index
    %95 = vector.load %arg11[%c0_130, %c0_131] : memref<72x288xbf16, #tpu.memory_space<vmem>>, vector<8x288xbf16>
    tpu.vector_store %arg11[%c0_130, %c0_131], %94 {strides = array<i32>} : memref<72x288xbf16, #tpu.memory_space<vmem>>, vector<8x288xbf16>,
    %c0_132 = arith.constant 0 : index
    %c1_133 = arith.constant 1 : index
    %96 = vector.load %arg10[%c0_132, %c1_133] : memref<8x384xbf16, #tpu.memory_space<vmem>>, vector<8x288xbf16>
    %c8_134 = arith.constant 8 : index
    %c0_135 = arith.constant 0 : index
    %97 = vector.load %arg11[%c8_134, %c0_135] : memref<72x288xbf16, #tpu.memory_space<vmem>>, vector<8x288xbf16>
    tpu.vector_store %arg11[%c8_134, %c0_135], %96 {strides = array<i32>} : memref<72x288xbf16, #tpu.memory_space<vmem>>, vector<8x288xbf16>,
    %c0_136 = arith.constant 0 : index
    %c2_137 = arith.constant 2 : index
    %98 = vector.load %arg10[%c0_136, %c2_137] : memref<8x384xbf16, #tpu.memory_space<vmem>>, vector<8x288xbf16>
    %c16_138 = arith.constant 16 : index
    %c0_139 = arith.constant 0 : index
    %99 = vector.load %arg11[%c16_138, %c0_139] : memref<72x288xbf16, #tpu.memory_space<vmem>>, vector<8x288xbf16>
    tpu.vector_store %arg11[%c16_138, %c0_139], %98 {strides = array<i32>} : memref<72x288xbf16, #tpu.memory_space<vmem>>, vector<8x288xbf16>,
    %c0_140 = arith.constant 0 : index
    %c18_141 = arith.constant 18 : index
    %100 = vector.load %arg10[%c0_140, %c18_141] : memref<8x384xbf16, #tpu.memory_space<vmem>>, vector<8x288xbf16>
    %c24_142 = arith.constant 24 : index
    %c0_143 = arith.constant 0 : index
    %101 = vector.load %arg11[%c24_142, %c0_143] : memref<72x288xbf16, #tpu.memory_space<vmem>>, vector<8x288xbf16>
    tpu.vector_store %arg11[%c24_142, %c0_143], %100 {strides = array<i32>} : memref<72x288xbf16, #tpu.memory_space<vmem>>, vector<8x288xbf16>,
    %c0_144 = arith.constant 0 : index
    %c19_145 = arith.constant 19 : index
    %102 = vector.load %arg10[%c0_144, %c19_145] : memref<8x384xbf16, #tpu.memory_space<vmem>>, vector<8x288xbf16>
    %c32_146 = arith.constant 32 : index
    %c0_147 = arith.constant 0 : index
    %103 = vector.load %arg11[%c32_146, %c0_147] : memref<72x288xbf16, #tpu.memory_space<vmem>>, vector<8x288xbf16>
    tpu.vector_store %arg11[%c32_146, %c0_147], %102 {strides = array<i32>} : memref<72x288xbf16, #tpu.memory_space<vmem>>, vector<8x288xbf16>,
    %c0_148 = arith.constant 0 : index
    %c20_149 = arith.constant 20 : index
    %104 = vector.load %arg10[%c0_148, %c20_149] : memref<8x384xbf16, #tpu.memory_space<vmem>>, vector<8x288xbf16>
    %c40_150 = arith.constant 40 : index
    %c0_151 = arith.constant 0 : index
    %105 = vector.load %arg11[%c40_150, %c0_151] : memref<72x288xbf16, #tpu.memory_space<vmem>>, vector<8x288xbf16>
    tpu.vector_store %arg11[%c40_150, %c0_151], %104 {strides = array<i32>} : memref<72x288xbf16, #tpu.memory_space<vmem>>, vector<8x288xbf16>,
    %c0_152 = arith.constant 0 : index
    %c36_153 = arith.constant 36 : index
    %106 = vector.load %arg10[%c0_152, %c36_153] : memref<8x384xbf16, #tpu.memory_space<vmem>>, vector<8x288xbf16>
    %c48_154 = arith.constant 48 : index
    %c0_155 = arith.constant 0 : index
    %107 = vector.load %arg11[%c48_154, %c0_155] : memref<72x288xbf16, #tpu.memory_space<vmem>>, vector<8x288xbf16>
    tpu.vector_store %arg11[%c48_154, %c0_155], %106 {strides = array<i32>} : memref<72x288xbf16, #tpu.memory_space<vmem>>, vector<8x288xbf16>,
    %c0_156 = arith.constant 0 : index
    %c37_157 = arith.constant 37 : index
    %108 = vector.load %arg10[%c0_156, %c37_157] : memref<8x384xbf16, #tpu.memory_space<vmem>>, vector<8x288xbf16>
    %c56_158 = arith.constant 56 : index
    %c0_159 = arith.constant 0 : index
    %109 = vector.load %arg11[%c56_158, %c0_159] : memref<72x288xbf16, #tpu.memory_space<vmem>>, vector<8x288xbf16>
    tpu.vector_store %arg11[%c56_158, %c0_159], %108 {strides = array<i32>} : memref<72x288xbf16, #tpu.memory_space<vmem>>, vector<8x288xbf16>,
    %c0_160 = arith.constant 0 : index
    %c38_161 = arith.constant 38 : index
    %110 = vector.load %arg10[%c0_160, %c38_161] : memref<8x384xbf16, #tpu.memory_space<vmem>>, vector<8x288xbf16>
    %c64_162 = arith.constant 64 : index
    %c0_163 = arith.constant 0 : index
    %111 = vector.load %arg11[%c64_162, %c0_163] : memref<72x288xbf16, #tpu.memory_space<vmem>>, vector<8x288xbf16>
    tpu.vector_store %arg11[%c64_162, %c0_163], %110 {strides = array<i32>} : memref<72x288xbf16, #tpu.memory_space<vmem>>, vector<8x288xbf16>,
    %c0_164 = arith.constant 0 : index
    %c0_165 = arith.constant 0 : index
    %112 = vector.load %arg4[%c0_164, %c0_165] : memref<8x72xbf16, #tpu.memory_space<vmem>>, vector<8x72xbf16>
    %c0_166 = arith.constant 0 : index
    %c0_167 = arith.constant 0 : index
    %113 = vector.load %arg11[%c0_166, %c0_167] : memref<72x288xbf16, #tpu.memory_space<vmem>>, vector<72x288xbf16>
    %cst_168 = arith.constant dense<0.000000e+00> : vector<8x288xf32>
    %114 = tpu.matmul %112, %113, %cst_168 {dimension_numbers = #tpu.dot_dimension_numbers<[1], [0], [0], [1], [0, 0, 1, 1], [], []>} : vector<8x72xbf16>, vector<72x288xbf16>, vector<8x288xf32> -> vector<8x288xf32>
    %c0_169 = arith.constant 0 : index
    %c0_170 = arith.constant 0 : index
    %115 = vector.load %arg5[%c0_169, %c0_170] : memref<8x288xf32, #tpu.memory_space<vmem>>, vector<8x288xf32>
    %116 = arith.addf %114, %115 : vector<8x288xf32>
    %cst_171 = arith.constant 0.000000e+00 : f32
    %117 = vector.broadcast %cst_171 : f32 to vector<8x288xf32>
    %118 = arith.maximumf %116, %117 : vector<8x288xf32>
    %119 = arith.mulf %118, %31 : vector<8x288xf32>
    %120 = arith.truncf %119 : vector<8x288xf32> to vector<8x288xbf16>
    %c0_172 = arith.constant 0 : index
    %c19_173 = arith.constant 19 : index
    %121 = vector.load %arg10[%c0_172, %c19_173] : memref<8x384xbf16, #tpu.memory_space<vmem>>, vector<8x288xbf16>
    tpu.vector_store %arg10[%c0_172, %c19_173], %120 {strides = array<i32>} : memref<8x384xbf16, #tpu.memory_space<vmem>>, vector<8x288xbf16>,
    %c0_174 = arith.constant 0 : index
    %c0_175 = arith.constant 0 : index
    %122 = vector.load %arg10[%c0_174, %c0_175] : memref<8x384xbf16, #tpu.memory_space<vmem>>, vector<8x288xbf16>
    %c0_176 = arith.constant 0 : index
    %c0_177 = arith.constant 0 : index
    %123 = vector.load %arg11[%c0_176, %c0_177] : memref<72x288xbf16, #tpu.memory_space<vmem>>, vector<8x288xbf16>
    tpu.vector_store %arg11[%c0_176, %c0_177], %122 {strides = array<i32>} : memref<72x288xbf16, #tpu.memory_space<vmem>>, vector<8x288xbf16>,
    %c0_178 = arith.constant 0 : index
    %c1_179 = arith.constant 1 : index
    %124 = vector.load %arg10[%c0_178, %c1_179] : memref<8x384xbf16, #tpu.memory_space<vmem>>, vector<8x288xbf16>
    %c8_180 = arith.constant 8 : index
    %c0_181 = arith.constant 0 : index
    %125 = vector.load %arg11[%c8_180, %c0_181] : memref<72x288xbf16, #tpu.memory_space<vmem>>, vector<8x288xbf16>
    tpu.vector_store %arg11[%c8_180, %c0_181], %124 {strides = array<i32>} : memref<72x288xbf16, #tpu.memory_space<vmem>>, vector<8x288xbf16>,
    %c0_182 = arith.constant 0 : index
    %c2_183 = arith.constant 2 : index
    %126 = vector.load %arg10[%c0_182, %c2_183] : memref<8x384xbf16, #tpu.memory_space<vmem>>, vector<8x288xbf16>
    %c16_184 = arith.constant 16 : index
    %c0_185 = arith.constant 0 : index
    %127 = vector.load %arg11[%c16_184, %c0_185] : memref<72x288xbf16, #tpu.memory_space<vmem>>, vector<8x288xbf16>
    tpu.vector_store %arg11[%c16_184, %c0_185], %126 {strides = array<i32>} : memref<72x288xbf16, #tpu.memory_space<vmem>>, vector<8x288xbf16>,
    %c0_186 = arith.constant 0 : index
    %c18_187 = arith.constant 18 : index
    %128 = vector.load %arg10[%c0_186, %c18_187] : memref<8x384xbf16, #tpu.memory_space<vmem>>, vector<8x288xbf16>
    %c24_188 = arith.constant 24 : index
    %c0_189 = arith.constant 0 : index
    %129 = vector.load %arg11[%c24_188, %c0_189] : memref<72x288xbf16, #tpu.memory_space<vmem>>, vector<8x288xbf16>
    tpu.vector_store %arg11[%c24_188, %c0_189], %128 {strides = array<i32>} : memref<72x288xbf16, #tpu.memory_space<vmem>>, vector<8x288xbf16>,
    %c0_190 = arith.constant 0 : index
    %c19_191 = arith.constant 19 : index
    %130 = vector.load %arg10[%c0_190, %c19_191] : memref<8x384xbf16, #tpu.memory_space<vmem>>, vector<8x288xbf16>
    %c32_192 = arith.constant 32 : index
    %c0_193 = arith.constant 0 : index
    %131 = vector.load %arg11[%c32_192, %c0_193] : memref<72x288xbf16, #tpu.memory_space<vmem>>, vector<8x288xbf16>
    tpu.vector_store %arg11[%c32_192, %c0_193], %130 {strides = array<i32>} : memref<72x288xbf16, #tpu.memory_space<vmem>>, vector<8x288xbf16>,
    %c0_194 = arith.constant 0 : index
    %c20_195 = arith.constant 20 : index
    %132 = vector.load %arg10[%c0_194, %c20_195] : memref<8x384xbf16, #tpu.memory_space<vmem>>, vector<8x288xbf16>
    %c40_196 = arith.constant 40 : index
    %c0_197 = arith.constant 0 : index
    %133 = vector.load %arg11[%c40_196, %c0_197] : memref<72x288xbf16, #tpu.memory_space<vmem>>, vector<8x288xbf16>
    tpu.vector_store %arg11[%c40_196, %c0_197], %132 {strides = array<i32>} : memref<72x288xbf16, #tpu.memory_space<vmem>>, vector<8x288xbf16>,
    %c0_198 = arith.constant 0 : index
    %c36_199 = arith.constant 36 : index
    %134 = vector.load %arg10[%c0_198, %c36_199] : memref<8x384xbf16, #tpu.memory_space<vmem>>, vector<8x288xbf16>
    %c48_200 = arith.constant 48 : index
    %c0_201 = arith.constant 0 : index
    %135 = vector.load %arg11[%c48_200, %c0_201] : memref<72x288xbf16, #tpu.memory_space<vmem>>, vector<8x288xbf16>
    tpu.vector_store %arg11[%c48_200, %c0_201], %134 {strides = array<i32>} : memref<72x288xbf16, #tpu.memory_space<vmem>>, vector<8x288xbf16>,
    %c0_202 = arith.constant 0 : index
    %c37_203 = arith.constant 37 : index
    %136 = vector.load %arg10[%c0_202, %c37_203] : memref<8x384xbf16, #tpu.memory_space<vmem>>, vector<8x288xbf16>
    %c56_204 = arith.constant 56 : index
    %c0_205 = arith.constant 0 : index
    %137 = vector.load %arg11[%c56_204, %c0_205] : memref<72x288xbf16, #tpu.memory_space<vmem>>, vector<8x288xbf16>
    tpu.vector_store %arg11[%c56_204, %c0_205], %136 {strides = array<i32>} : memref<72x288xbf16, #tpu.memory_space<vmem>>, vector<8x288xbf16>,
    %c0_206 = arith.constant 0 : index
    %c38_207 = arith.constant 38 : index
    %138 = vector.load %arg10[%c0_206, %c38_207] : memref<8x384xbf16, #tpu.memory_space<vmem>>, vector<8x288xbf16>
    %c64_208 = arith.constant 64 : index
    %c0_209 = arith.constant 0 : index
    %139 = vector.load %arg11[%c64_208, %c0_209] : memref<72x288xbf16, #tpu.memory_space<vmem>>, vector<8x288xbf16>
    tpu.vector_store %arg11[%c64_208, %c0_209], %138 {strides = array<i32>} : memref<72x288xbf16, #tpu.memory_space<vmem>>, vector<8x288xbf16>,
    %c0_210 = arith.constant 0 : index
    %c0_211 = arith.constant 0 : index
    %140 = vector.load %arg6[%c0_210, %c0_211] : memref<8x72xbf16, #tpu.memory_space<vmem>>, vector<8x72xbf16>
    %c0_212 = arith.constant 0 : index
    %c0_213 = arith.constant 0 : index
    %141 = vector.load %arg11[%c0_212, %c0_213] : memref<72x288xbf16, #tpu.memory_space<vmem>>, vector<72x288xbf16>
    %cst_214 = arith.constant dense<0.000000e+00> : vector<8x288xf32>
    %142 = tpu.matmul %140, %141, %cst_214 {dimension_numbers = #tpu.dot_dimension_numbers<[1], [0], [0], [1], [0, 0, 1, 1], [], []>} : vector<8x72xbf16>, vector<72x288xbf16>, vector<8x288xf32> -> vector<8x288xf32>
    %c0_215 = arith.constant 0 : index
    %c0_216 = arith.constant 0 : index
    %143 = vector.load %arg7[%c0_215, %c0_216] : memref<8x288xf32, #tpu.memory_space<vmem>>, vector<8x288xf32>
    %144 = arith.addf %142, %143 : vector<8x288xf32>
    %145 = arith.addf %144, %30 : vector<8x288xf32>
    %cst_217 = arith.constant 0.000000e+00 : f32
    %146 = vector.broadcast %cst_217 : f32 to vector<8x288xf32>
    %147 = arith.maximumf %145, %146 : vector<8x288xf32>
    %148 = arith.mulf %147, %31 : vector<8x288xf32>
    %149 = arith.truncf %148 : vector<8x288xf32> to vector<8x288xbf16>
    %c0_218 = arith.constant 0 : index
    %c19_219 = arith.constant 19 : index
    %150 = vector.load %arg10[%c0_218, %c19_219] : memref<8x384xbf16, #tpu.memory_space<vmem>>, vector<8x288xbf16>
    tpu.vector_store %arg10[%c0_218, %c19_219], %149 {strides = array<i32>} : memref<8x384xbf16, #tpu.memory_space<vmem>>, vector<8x288xbf16>,
    %c0_220 = arith.constant 0 : index
    %c0_221 = arith.constant 0 : index
    %151 = vector.load %arg10[%c0_220, %c0_221] : memref<8x384xbf16, #tpu.memory_space<vmem>>, vector<8x288xbf16>
    %c0_222 = arith.constant 0 : index
    %c0_223 = arith.constant 0 : index
    %152 = vector.load %arg11[%c0_222, %c0_223] : memref<72x288xbf16, #tpu.memory_space<vmem>>, vector<8x288xbf16>
    tpu.vector_store %arg11[%c0_222, %c0_223], %151 {strides = array<i32>} : memref<72x288xbf16, #tpu.memory_space<vmem>>, vector<8x288xbf16>,
    %c0_224 = arith.constant 0 : index
    %c1_225 = arith.constant 1 : index
    %153 = vector.load %arg10[%c0_224, %c1_225] : memref<8x384xbf16, #tpu.memory_space<vmem>>, vector<8x288xbf16>
    %c8_226 = arith.constant 8 : index
    %c0_227 = arith.constant 0 : index
    %154 = vector.load %arg11[%c8_226, %c0_227] : memref<72x288xbf16, #tpu.memory_space<vmem>>, vector<8x288xbf16>
    tpu.vector_store %arg11[%c8_226, %c0_227], %153 {strides = array<i32>} : memref<72x288xbf16, #tpu.memory_space<vmem>>, vector<8x288xbf16>,
    %c0_228 = arith.constant 0 : index
    %c2_229 = arith.constant 2 : index
    %155 = vector.load %arg10[%c0_228, %c2_229] : memref<8x384xbf16, #tpu.memory_space<vmem>>, vector<8x288xbf16>
    %c16_230 = arith.constant 16 : index
    %c0_231 = arith.constant 0 : index
    %156 = vector.load %arg11[%c16_230, %c0_231] : memref<72x288xbf16, #tpu.memory_space<vmem>>, vector<8x288xbf16>
    tpu.vector_store %arg11[%c16_230, %c0_231], %155 {strides = array<i32>} : memref<72x288xbf16, #tpu.memory_space<vmem>>, vector<8x288xbf16>,
    %c0_232 = arith.constant 0 : index
    %c18_233 = arith.constant 18 : index
    %157 = vector.load %arg10[%c0_232, %c18_233] : memref<8x384xbf16, #tpu.memory_space<vmem>>, vector<8x288xbf16>
    %c24_234 = arith.constant 24 : index
    %c0_235 = arith.constant 0 : index
    %158 = vector.load %arg11[%c24_234, %c0_235] : memref<72x288xbf16, #tpu.memory_space<vmem>>, vector<8x288xbf16>
    tpu.vector_store %arg11[%c24_234, %c0_235], %157 {strides = array<i32>} : memref<72x288xbf16, #tpu.memory_space<vmem>>, vector<8x288xbf16>,
    %c0_236 = arith.constant 0 : index
    %c19_237 = arith.constant 19 : index
    %159 = vector.load %arg10[%c0_236, %c19_237] : memref<8x384xbf16, #tpu.memory_space<vmem>>, vector<8x288xbf16>
    %c32_238 = arith.constant 32 : index
    %c0_239 = arith.constant 0 : index
    %160 = vector.load %arg11[%c32_238, %c0_239] : memref<72x288xbf16, #tpu.memory_space<vmem>>, vector<8x288xbf16>
    tpu.vector_store %arg11[%c32_238, %c0_239], %159 {strides = array<i32>} : memref<72x288xbf16, #tpu.memory_space<vmem>>, vector<8x288xbf16>,
    %c0_240 = arith.constant 0 : index
    %c20_241 = arith.constant 20 : index
    %161 = vector.load %arg10[%c0_240, %c20_241] : memref<8x384xbf16, #tpu.memory_space<vmem>>, vector<8x288xbf16>
    %c40_242 = arith.constant 40 : index
    %c0_243 = arith.constant 0 : index
    %162 = vector.load %arg11[%c40_242, %c0_243] : memref<72x288xbf16, #tpu.memory_space<vmem>>, vector<8x288xbf16>
    tpu.vector_store %arg11[%c40_242, %c0_243], %161 {strides = array<i32>} : memref<72x288xbf16, #tpu.memory_space<vmem>>, vector<8x288xbf16>,
    %c0_244 = arith.constant 0 : index
    %c36_245 = arith.constant 36 : index
    %163 = vector.load %arg10[%c0_244, %c36_245] : memref<8x384xbf16, #tpu.memory_space<vmem>>, vector<8x288xbf16>
    %c48_246 = arith.constant 48 : index
    %c0_247 = arith.constant 0 : index
    %164 = vector.load %arg11[%c48_246, %c0_247] : memref<72x288xbf16, #tpu.memory_space<vmem>>, vector<8x288xbf16>
    tpu.vector_store %arg11[%c48_246, %c0_247], %163 {strides = array<i32>} : memref<72x288xbf16, #tpu.memory_space<vmem>>, vector<8x288xbf16>,
    %c0_248 = arith.constant 0 : index
    %c37_249 = arith.constant 37 : index
    %165 = vector.load %arg10[%c0_248, %c37_249] : memref<8x384xbf16, #tpu.memory_space<vmem>>, vector<8x288xbf16>
    %c56_250 = arith.constant 56 : index
    %c0_251 = arith.constant 0 : index
    %166 = vector.load %arg11[%c56_250, %c0_251] : memref<72x288xbf16, #tpu.memory_space<vmem>>, vector<8x288xbf16>
    tpu.vector_store %arg11[%c56_250, %c0_251], %165 {strides = array<i32>} : memref<72x288xbf16, #tpu.memory_space<vmem>>, vector<8x288xbf16>,
    %c0_252 = arith.constant 0 : index
    %c38_253 = arith.constant 38 : index
    %167 = vector.load %arg10[%c0_252, %c38_253] : memref<8x384xbf16, #tpu.memory_space<vmem>>, vector<8x288xbf16>
    %c64_254 = arith.constant 64 : index
    %c0_255 = arith.constant 0 : index
    %168 = vector.load %arg11[%c64_254, %c0_255] : memref<72x288xbf16, #tpu.memory_space<vmem>>, vector<8x288xbf16>
    tpu.vector_store %arg11[%c64_254, %c0_255], %167 {strides = array<i32>} : memref<72x288xbf16, #tpu.memory_space<vmem>>, vector<8x288xbf16>,
    %c0_256 = arith.constant 0 : index
    %c0_257 = arith.constant 0 : index
    %169 = vector.load %arg4[%c0_256, %c0_257] : memref<8x72xbf16, #tpu.memory_space<vmem>>, vector<8x72xbf16>
    %c0_258 = arith.constant 0 : index
    %c0_259 = arith.constant 0 : index
    %170 = vector.load %arg11[%c0_258, %c0_259] : memref<72x288xbf16, #tpu.memory_space<vmem>>, vector<72x288xbf16>
    %cst_260 = arith.constant dense<0.000000e+00> : vector<8x288xf32>
    %171 = tpu.matmul %169, %170, %cst_260 {dimension_numbers = #tpu.dot_dimension_numbers<[1], [0], [0], [1], [0, 0, 1, 1], [], []>} : vector<8x72xbf16>, vector<72x288xbf16>, vector<8x288xf32> -> vector<8x288xf32>
    %c0_261 = arith.constant 0 : index
    %c0_262 = arith.constant 0 : index
    %172 = vector.load %arg5[%c0_261, %c0_262] : memref<8x288xf32, #tpu.memory_space<vmem>>, vector<8x288xf32>
    %173 = arith.addf %171, %172 : vector<8x288xf32>
    %cst_263 = arith.constant 0.000000e+00 : f32
    %174 = vector.broadcast %cst_263 : f32 to vector<8x288xf32>
    %175 = arith.maximumf %173, %174 : vector<8x288xf32>
    %176 = arith.mulf %175, %31 : vector<8x288xf32>
    %177 = arith.truncf %176 : vector<8x288xf32> to vector<8x288xbf16>
    %c0_264 = arith.constant 0 : index
    %c19_265 = arith.constant 19 : index
    %178 = vector.load %arg10[%c0_264, %c19_265] : memref<8x384xbf16, #tpu.memory_space<vmem>>, vector<8x288xbf16>
    tpu.vector_store %arg10[%c0_264, %c19_265], %177 {strides = array<i32>} : memref<8x384xbf16, #tpu.memory_space<vmem>>, vector<8x288xbf16>,
    %c0_266 = arith.constant 0 : index
    %c0_267 = arith.constant 0 : index
    %179 = vector.load %arg10[%c0_266, %c0_267] : memref<8x384xbf16, #tpu.memory_space<vmem>>, vector<8x288xbf16>
    %c0_268 = arith.constant 0 : index
    %c0_269 = arith.constant 0 : index
    %180 = vector.load %arg11[%c0_268, %c0_269] : memref<72x288xbf16, #tpu.memory_space<vmem>>, vector<8x288xbf16>
    tpu.vector_store %arg11[%c0_268, %c0_269], %179 {strides = array<i32>} : memref<72x288xbf16, #tpu.memory_space<vmem>>, vector<8x288xbf16>,
    %c0_270 = arith.constant 0 : index
    %c1_271 = arith.constant 1 : index
    %181 = vector.load %arg10[%c0_270, %c1_271] : memref<8x384xbf16, #tpu.memory_space<vmem>>, vector<8x288xbf16>
    %c8_272 = arith.constant 8 : index
    %c0_273 = arith.constant 0 : index
    %182 = vector.load %arg11[%c8_272, %c0_273] : memref<72x288xbf16, #tpu.memory_space<vmem>>, vector<8x288xbf16>
    tpu.vector_store %arg11[%c8_272, %c0_273], %181 {strides = array<i32>} : memref<72x288xbf16, #tpu.memory_space<vmem>>, vector<8x288xbf16>,
    %c0_274 = arith.constant 0 : index
    %c2_275 = arith.constant 2 : index
    %183 = vector.load %arg10[%c0_274, %c2_275] : memref<8x384xbf16, #tpu.memory_space<vmem>>, vector<8x288xbf16>
    %c16_276 = arith.constant 16 : index
    %c0_277 = arith.constant 0 : index
    %184 = vector.load %arg11[%c16_276, %c0_277] : memref<72x288xbf16, #tpu.memory_space<vmem>>, vector<8x288xbf16>
    tpu.vector_store %arg11[%c16_276, %c0_277], %183 {strides = array<i32>} : memref<72x288xbf16, #tpu.memory_space<vmem>>, vector<8x288xbf16>,
    %c0_278 = arith.constant 0 : index
    %c18_279 = arith.constant 18 : index
    %185 = vector.load %arg10[%c0_278, %c18_279] : memref<8x384xbf16, #tpu.memory_space<vmem>>, vector<8x288xbf16>
    %c24_280 = arith.constant 24 : index
    %c0_281 = arith.constant 0 : index
    %186 = vector.load %arg11[%c24_280, %c0_281] : memref<72x288xbf16, #tpu.memory_space<vmem>>, vector<8x288xbf16>
    tpu.vector_store %arg11[%c24_280, %c0_281], %185 {strides = array<i32>} : memref<72x288xbf16, #tpu.memory_space<vmem>>, vector<8x288xbf16>,
    %c0_282 = arith.constant 0 : index
    %c19_283 = arith.constant 19 : index
    %187 = vector.load %arg10[%c0_282, %c19_283] : memref<8x384xbf16, #tpu.memory_space<vmem>>, vector<8x288xbf16>
    %c32_284 = arith.constant 32 : index
    %c0_285 = arith.constant 0 : index
    %188 = vector.load %arg11[%c32_284, %c0_285] : memref<72x288xbf16, #tpu.memory_space<vmem>>, vector<8x288xbf16>
    tpu.vector_store %arg11[%c32_284, %c0_285], %187 {strides = array<i32>} : memref<72x288xbf16, #tpu.memory_space<vmem>>, vector<8x288xbf16>,
    %c0_286 = arith.constant 0 : index
    %c20_287 = arith.constant 20 : index
    %189 = vector.load %arg10[%c0_286, %c20_287] : memref<8x384xbf16, #tpu.memory_space<vmem>>, vector<8x288xbf16>
    %c40_288 = arith.constant 40 : index
    %c0_289 = arith.constant 0 : index
    %190 = vector.load %arg11[%c40_288, %c0_289] : memref<72x288xbf16, #tpu.memory_space<vmem>>, vector<8x288xbf16>
    tpu.vector_store %arg11[%c40_288, %c0_289], %189 {strides = array<i32>} : memref<72x288xbf16, #tpu.memory_space<vmem>>, vector<8x288xbf16>,
    %c0_290 = arith.constant 0 : index
    %c36_291 = arith.constant 36 : index
    %191 = vector.load %arg10[%c0_290, %c36_291] : memref<8x384xbf16, #tpu.memory_space<vmem>>, vector<8x288xbf16>
    %c48_292 = arith.constant 48 : index
    %c0_293 = arith.constant 0 : index
    %192 = vector.load %arg11[%c48_292, %c0_293] : memref<72x288xbf16, #tpu.memory_space<vmem>>, vector<8x288xbf16>
    tpu.vector_store %arg11[%c48_292, %c0_293], %191 {strides = array<i32>} : memref<72x288xbf16, #tpu.memory_space<vmem>>, vector<8x288xbf16>,
    %c0_294 = arith.constant 0 : index
    %c37_295 = arith.constant 37 : index
    %193 = vector.load %arg10[%c0_294, %c37_295] : memref<8x384xbf16, #tpu.memory_space<vmem>>, vector<8x288xbf16>
    %c56_296 = arith.constant 56 : index
    %c0_297 = arith.constant 0 : index
    %194 = vector.load %arg11[%c56_296, %c0_297] : memref<72x288xbf16, #tpu.memory_space<vmem>>, vector<8x288xbf16>
    tpu.vector_store %arg11[%c56_296, %c0_297], %193 {strides = array<i32>} : memref<72x288xbf16, #tpu.memory_space<vmem>>, vector<8x288xbf16>,
    %c0_298 = arith.constant 0 : index
    %c38_299 = arith.constant 38 : index
    %195 = vector.load %arg10[%c0_298, %c38_299] : memref<8x384xbf16, #tpu.memory_space<vmem>>, vector<8x288xbf16>
    %c64_300 = arith.constant 64 : index
    %c0_301 = arith.constant 0 : index
    %196 = vector.load %arg11[%c64_300, %c0_301] : memref<72x288xbf16, #tpu.memory_space<vmem>>, vector<8x288xbf16>
    tpu.vector_store %arg11[%c64_300, %c0_301], %195 {strides = array<i32>} : memref<72x288xbf16, #tpu.memory_space<vmem>>, vector<8x288xbf16>,
    %c0_302 = arith.constant 0 : index
    %c0_303 = arith.constant 0 : index
    %197 = vector.load %arg6[%c0_302, %c0_303] : memref<8x72xbf16, #tpu.memory_space<vmem>>, vector<8x72xbf16>
    %c0_304 = arith.constant 0 : index
    %c0_305 = arith.constant 0 : index
    %198 = vector.load %arg11[%c0_304, %c0_305] : memref<72x288xbf16, #tpu.memory_space<vmem>>, vector<72x288xbf16>
    %cst_306 = arith.constant dense<0.000000e+00> : vector<8x288xf32>
    %199 = tpu.matmul %197, %198, %cst_306 {dimension_numbers = #tpu.dot_dimension_numbers<[1], [0], [0], [1], [0, 0, 1, 1], [], []>} : vector<8x72xbf16>, vector<72x288xbf16>, vector<8x288xf32> -> vector<8x288xf32>
    %c0_307 = arith.constant 0 : index
    %c0_308 = arith.constant 0 : index
    %200 = vector.load %arg7[%c0_307, %c0_308] : memref<8x288xf32, #tpu.memory_space<vmem>>, vector<8x288xf32>
    %201 = arith.addf %199, %200 : vector<8x288xf32>
    %202 = arith.addf %201, %30 : vector<8x288xf32>
    %c0_309 = arith.constant 0 : index
    %c0_310 = arith.constant 0 : index
    %c0_311 = arith.constant 0 : index
    %203 = vector.load %arg9[%c0_309, %c0_310, %c0_311] : memref<1x8x288xf32, #tpu.memory_space<vmem>>, vector<1x8x288xf32>
    %204 = vector.shape_cast %203 : vector<1x8x288xf32> to vector<8x288xf32>
    %205 = vector.shape_cast %202 : vector<8x288xf32> to vector<1x8x288xf32>
    tpu.vector_store %arg9[%c0_309, %c0_310, %c0_311], %205 {strides = array<i32>} : memref<1x8x288xf32, #tpu.memory_space<vmem>>, vector<1x8x288xf32>,
    return
  }
  func.func @transform_0(%arg0: i32) -> (i32, i32, i32) {
    %c0_i32 = arith.constant 0 : i32
    %c0_i32_0 = arith.constant 0 : i32
    %c0_i32_1 = arith.constant 0 : i32
    return %arg0, %c0_i32, %c0_i32_0 : i32, i32, i32
  }
  func.func @transform_1(%arg0: i32) -> (i32, i32) {
    %c0_i32 = arith.constant 0 : i32
    %c0_i32_0 = arith.constant 0 : i32
    %c0_i32_1 = arith.constant 0 : i32
    return %c0_i32, %c0_i32_0 : i32, i32
  }
  func.func @transform_2(%arg0: i32) -> (i32, i32) {
    %c0_i32 = arith.constant 0 : i32
    %c0_i32_0 = arith.constant 0 : i32
    %c0_i32_1 = arith.constant 0 : i32
    return %c0_i32, %c0_i32_0 : i32, i32
  }
  func.func @transform_3(%arg0: i32) -> (i32, i32) {
    %c0_i32 = arith.constant 0 : i32
    %c0_i32_0 = arith.constant 0 : i32
    %c0_i32_1 = arith.constant 0 : i32
    return %c0_i32, %c0_i32_0 : i32, i32
  }
  func.func @transform_4(%arg0: i32) -> (i32, i32) {
    %c0_i32 = arith.constant 0 : i32
    %c0_i32_0 = arith.constant 0 : i32
    %c0_i32_1 = arith.constant 0 : i32
    return %c0_i32, %c0_i32_0 : i32, i32
  }
  func.func @transform_5(%arg0: i32) -> (i32, i32) {
    %c0_i32 = arith.constant 0 : i32
    %c0_i32_0 = arith.constant 0 : i32
    %c0_i32_1 = arith.constant 0 : i32
    return %c0_i32, %c0_i32_0 : i32, i32
  }
  func.func @transform_6(%arg0: i32) -> (i32, i32) {
    %c0_i32 = arith.constant 0 : i32
    %c0_i32_0 = arith.constant 0 : i32
    %c0_i32_1 = arith.constant 0 : i32
    return %c0_i32, %c0_i32_0 : i32, i32
  }
  func.func @transform_7(%arg0: i32) -> (i32, i32) {
    %c0_i32 = arith.constant 0 : i32
    %c0_i32_0 = arith.constant 0 : i32
    %c0_i32_1 = arith.constant 0 : i32
    return %c0_i32, %c0_i32_0 : i32, i32
  }
  func.func @transform_8(%arg0: i32) -> (i32, i32, i32) {
    %c0_i32 = arith.constant 0 : i32
    %c0_i32_0 = arith.constant 0 : i32
    %c0_i32_1 = arith.constant 0 : i32
    return %arg0, %c0_i32, %c0_i32_0 : i32, i32, i32
  }
}

</mosaic_0001>

<bundles_post_ra>
// kernel: recursive_block_forward.1
= control target key start
LH: loop header
LB: loop body
LE: loop exit
PB: predicated region body
PF: predicated region fallthrough
CT: control target
= control target key end

     0   :  { %s3225_s27 = smov 0   ;;  %s3825_s0 = inlined_call_operand.vmem [shape: f32[2,4,288], index: 0, kind: input, shape index: {}]   ;;  %s3826_s1 = inlined_call_operand.vmem [shape: bf16[8,36], index: 1, kind: input, shape index: {}]   ;;  %s3827_s2 = inlined_call_operand.vmem [shape: f32[8,288], index: 2, kind: input, shape index: {}]   ;;  %s3828_s3 = inlined_call_operand.vmem [shape: bf16[8,72], index: 3, kind: input, shape index: {}]   ;;  %s3829_s4 = inlined_call_operand.vmem [shape: f32[8,288], index: 4, kind: input, shape index: {}]   ;;  %s3830_s5 = inlined_call_operand.vmem [shape: bf16[8,72], index: 5, kind: input, shape index: {}]   ;;  %s3831_s6 = inlined_call_operand.vmem [shape: f32[8,288], index: 6, kind: input, shape index: {}]   ;;  %s3832_s7 = inlined_call_operand.vmem [shape: f32[8,288], index: 7, kind: input, shape index: {}]   ;;  %s3833_s8 = inlined_call_operand.vmem [shape: f32[2,8,288], index: 8, kind: output, shape index: {}]  }
   0x1 LB: > { %s2803_s28 = sadd.s32 4294967295, %s3166_s27   ;;  %p2807_p0 = scmp.ge.s32.totalorder %s3166_s27, 1  ;;  %s3166_s27 = sphi %s3225_s27, %s18_s27  }
   0x2   : > { %p262_p1 = scmp.lt.s32.totalorder %s3166_s27, 3 }
   0x4   : > { %p263_p2 = pnand %p2807_p0, %p262_p1 }
   0x5   : > { %p296_p3 = scmp.lt.s32.totalorder (!%p263_p2), %s2803_s28, 1  ;;  %v3168_v0 = vmov (!%p263_p2), 0   ;;  %s3169_s11 = smov (!%p263_p2), 19   ;;  %vm337_vm0 = vcmask (!%p263_p2), 1041560   ;;  %vm338_vm1 = vcmask (!%p263_p2), 1045508   ;;  %vm332_vm2 = vcmask (!%p263_p2), 154624  }
   0x6   : > { %266 = sbr.rel (%p263_p2) target bundleno = 3546 (0xdda), region = 52  ;;  %307 = vst [vmem:[#allocation2] sm:$0xff] (!%p263_p2), %v3168_v0  ;;  %308 = vst [vmem:[#allocation2 + $0x8] sm:$0xf] (!%p263_p2), %v3168_v0  ;;  %594 = vmatprep.mubr.bf16.mxu0 (!%p263_p2), %v3168_v0  ;;  %vm341_vm4 = vcmask (!%p263_p2), 410624   ;;  %s3170_s12 = smov (!%p263_p2), 126  }
   0x7   : > { %vm339_vm3 = vmor (!%p263_p2), %vm338_vm1, %vm337_vm0  ;;  %s3171_s13 = smov (!%p263_p2), 109   ;;  %vm346_vm5 = vcmask (!%p263_p2), 254976   ;;  %s3172_s14 = smov (!%p263_p2), 92   ;;  %v3177_v34 = vmov (!%p263_p2), 0.0   ;;  %vm3179_vm6 = vmmov (!%p263_p2), 0   ;;  %vm360_vm7 = vcmask (!%p263_p2), 1043456  }
   0x8   : > { %s3173_s15 = smov (!%p263_p2), 110   ;;  %s3174_s16 = smov (!%p263_p2), 127   ;;  %3000 = vmatprep.subr.bf16.mxu1 (!%p263_p2), %v3177_v34  ;;  %3006 = vmatprep.mubr.msk.bf16.mxu1 (!%p263_p2), %vm3179_vm6, %v3177_v34  ;;  %vm380_vm8 = vcmask (!%p263_p2), 1031168   ;;  %vm416_vm9 = vcmask (!%p263_p2), 891904   ;;  %vm452_vm10 = vcmask (!%p263_p2), 752640   ;;  %vm367_vm11 = vcmask (!%p263_p2), 257026  }
   0x9   : > { %s3175_s17 = smov (!%p263_p2), 108   ;;  %s3176_s18 = smov (!%p263_p2), 91   ;;  %vm362_vm12 = vcmask (!%p263_p2), 1039360   ;;  %vm399_vm13 = vcmask (!%p263_p2), 900096   ;;  %vm435_vm14 = vcmask (!%p263_p2), 883712   ;;  %vm471_vm15 = vcmask (!%p263_p2), 744448  }
   0xa   : > { %s3178_s19 = smov (!%p263_p2), 90   ;;  %vm488_vm0 = vcmask (!%p263_p2), 736256   ;;  %vm552_vm1 = vcmask (!%p263_p2), 1041408  }
   0xd   : > { %s3837_s28 = smov (!%p296_p3, %s2803_s28), 1 }
   0xe   : > { %s3094_s29 = smul.u32 12, %s3837_s28 }
  0x10   : > { %s300_s10 = scalar_lea.vmem %s3825_s0, %s3094_s29 }
  0x11   : > { %v309_v1 = vld [vmem:[%s300_s10] sm:$0xff]  ;;  %v310_v2 = vld [vmem:[%s300_s10 + $0x8] sm:$0xf] }
  0x12   : > { %v311_v3 = vmax.f32 %v309_v1, 0.0  ;;  %v312_v5 = vmax.f32 %v310_v2, 0.0 }
  0x14   : > { %v314_v4 = vcombine.high %v311_v3, %v311_v3  ;;  %v2947_v7 = vpack.c.bf16 %v312_v5, %v312_v5 }
  0x16   : > { %v2946_v6 = vpack.c.bf16 %v314_v4, %v311_v3 }
  0x18   : > { %327 = vrot.lane.b32.xlu0 %v2946_v6, %s3169_s11 }
  0x1c   : > { %329 = vrot.lane.b32.xlu0 %v2947_v7, %s3169_s11 }
  0x8a   : > { %v328_v8 = vpop.permute.xlu0 %327 }
  0x8b   : > { %v331_v9 = vrot.slane %v328_v8, 4 }
  0x8d   : > { %v333_v10 = vsel %vm332_vm2, %v331_v9, %v328_v8 }
  0x8e   : > { %340 = vst.msk [vmem:[#allocation2] sm:$0x33] %vm339_vm3, %v333_v10  ;;  %v330_v11 = vpop.permute.xlu0 %329  ;;  %vm548_vm3 = vcmask 293888  }
  0x8f   : > { %v334_v12 = vsel %vm332_vm2, %v331_v9, %v330_v11 }
  0x90   : > { %342 = vst.msk [vmem:[#allocation2 + $0x8] sm:$0x3] %vm341_vm4, %v334_v12  ;;  %vm672_vm4 = vcmask 1043608  }
  0x95   : > { %v343_v13 = vld [vmem:[#allocation2] sm:$0x33] }
  0x96   : > { %v369_v14 = vld [vmem:[#allocation2] sm:$0x33]  ;;  %345 = vst [vmem:[#allocation3] sm:$0x33] %v343_v13 }
  0x97   : > { %373 = vrot.lane.b32.xlu0 %v369_v14, %s3170_s12  ;;  %v370_v15 = vld [vmem:[#allocation2 + $0x8] sm:$0x3]  ;;  %v405_v16 = vld [vmem:[#allocation2] sm:$0x33] }
  0x98   : > { %375 = vrot.lane.b32.xlu1 %v370_v15, %s3170_s12  ;;  %v406_v17 = vld [vmem:[#allocation2 + $0x8] sm:$0x3]  ;;  %v441_v19 = vld [vmem:[#allocation2] sm:$0x33] }
  0x99   : > { %v344_v18 = vld [vmem:[#allocation2 + $0x8] sm:$0x3]  ;;  %v386_v20 = vld [vmem:[#allocation2] sm:$0x33] }
  0x9a   : > { %347 = vst.msk [vmem:[#allocation3 + $0x8] sm:$0x3] %vm346_vm5, %v344_v18  ;;  %v442_v21 = vld [vmem:[#allocation2 + $0x8] sm:$0x3]  ;;  %v348_v22 = vld [vmem:[#allocation2] sm:$0x33] }
  0x9b   : > { %409 = vrot.lane.b32.xlu0 %v405_v16, %s3171_s13  ;;  %v390_v23 = vrot.slane %v386_v20, 6  ;;  %v422_v24 = vld [vmem:[#allocation2] sm:$0x33]  ;;  %v352_v25 = vrot.slane %v348_v22, 6  ;;  %v349_v26 = vld [vmem:[#allocation2 + $0x8] sm:$0x3] }
  0x9c   : > { %411 = vrot.lane.b32.xlu1 %v406_v17, %s3171_s13  ;;  %v426_v27 = vrot.slane %v422_v24, 6  ;;  %v458_v28 = vld [vmem:[#allocation2] sm:$0x33]  ;;  %v353_v29 = vrot.slane %v349_v26, 6  ;;  %v387_v30 = vld [vmem:[#allocation2 + $0x8] sm:$0x3] }
  0x9d   : > { %v462_v31 = vrot.slane %v458_v28, 6  ;;  %v391_v32 = vrot.slane %v387_v30, 6  ;;  %v423_v33 = vld [vmem:[#allocation2 + $0x8] sm:$0x3]  ;;  %v477_v35 = vld [vmem:[#allocation2] sm:$0x33] }
  0x9e   : > { %v427_v36 = vrot.slane %v423_v33, 6  ;;  %v459_v37 = vld [vmem:[#allocation2 + $0x8] sm:$0x3] }
  0x9f   : > { %445 = vrot.lane.b32.xlu0 %v441_v19, %s3172_s14  ;;  %v463_v38 = vrot.slane %v459_v37, 6  ;;  %v478_v39 = vld [vmem:[#allocation2 + $0x8] sm:$0x3] }
  0xa0   : > { %447 = vrot.lane.b32.xlu1 %v442_v21, %s3172_s14 }
  0xa3   : > { %392 = vrot.lane.b32.xlu0 %v390_v23, %s3173_s15 }
  0xa4   : > { %354 = vrot.lane.b32.xlu1 %v352_v25, %s3174_s16 }
  0xa7   : > { %428 = vrot.lane.b32.xlu0 %v426_v27, %s3175_s17 }
  0xa8   : > { %356 = vrot.lane.b32.xlu1 %v353_v29, %s3174_s16 }
  0xab   : > { %464 = vrot.lane.b32.xlu0 %v462_v31, %s3176_s18 }
  0xac   : > { %394 = vrot.lane.b32.xlu1 %v391_v32, %s3173_s15 }
  0xaf   : > { %481 = vrot.lane.b32.xlu0 %v477_v35, %s3178_s19  ;;  %v494_v35 = vld [vmem:[%s3826_s1] sm:$0xf] }
  0xb0   : > { %430 = vrot.lane.b32.xlu1 %v427_v36, %s3175_s17 }
  0xb4   : > { %466 = vrot.lane.b32.xlu1 %v463_v38, %s3176_s18 }
  0xb8   : > { %483 = vrot.lane.b32.xlu1 %v478_v39, %s3178_s19  ;;  %v507_v39 = vld [vmem:[%s3827_s2 + $0x10] sm:$0xff] }
 0x109   : > { %v374_v40 = vpop.permute.xlu0 %373 }
 0x10a   : > { %v376_v41 = vpop.permute.xlu1 %375  ;;  %v377_v42 = vrot.slane %v374_v40, 4 }
 0x10b   : > { %v378_v43 = vrot.slane %v376_v41, 4  ;;  %385 = vst.msk [vmem:[#allocation3 + $0x14] sm:$0x3] %vm346_vm5, %v376_v41 }
 0x10d   : > { %v410_v44 = vpop.permute.xlu0 %409  ;;  %v379_v45 = vsel %vm360_vm7, %v377_v42, %v378_v43  ;;  %v505_v43 = vld [vmem:[%s3827_s2] sm:$0xff] }
 0x10e   : > { %v381_v46 = vsel %vm380_vm8, %v374_v40, %v379_v45  ;;  %v412_v47 = vpop.permute.xlu1 %411  ;;  %v413_v48 = vrot.slane %v410_v44, 4  ;;  %v3310_v45 = vld [vmem:[%s3832_s7 + $0x10] sm:$0xff] }
 0x10f   : > { %384 = vst [vmem:[#allocation3 + $0xc] sm:$0x33] %v381_v46  ;;  %v414_v49 = vrot.slane %v412_v47, 4  ;;  %421 = vst.msk [vmem:[#allocation3 + $0x20] sm:$0x3] %vm346_vm5, %v412_v47  ;;  %v506_v46 = vld [vmem:[%s3827_s2 + $0x8] sm:$0xff] }
 0x111   : > { %v446_v50 = vpop.permute.xlu0 %445  ;;  %v415_v51 = vsel %vm360_vm7, %v413_v48, %v414_v49 }
 0x112   : > { %v417_v52 = vsel %vm416_vm9, %v410_v44, %v415_v51  ;;  %v448_v53 = vpop.permute.xlu1 %447  ;;  %v449_v54 = vrot.slane %v446_v50, 4 }
 0x113   : > { %420 = vst [vmem:[#allocation3 + $0x18] sm:$0x33] %v417_v52  ;;  %v450_v55 = vrot.slane %v448_v53, 4  ;;  %457 = vst.msk [vmem:[#allocation3 + $0x2c] sm:$0x3] %vm346_vm5, %v448_v53 }
 0x115   : > { %v451_v56 = vsel %vm360_vm7, %v449_v54, %v450_v55  ;;  %v393_v58 = vpop.permute.xlu0 %392  ;;  %v3324_v55 = vld [vmem:[%s3832_s7] sm:$0xff] }
 0x116   : > { %v453_v57 = vsel %vm452_vm10, %v446_v50, %v451_v56  ;;  %v355_v59 = vpop.permute.xlu1 %354  ;;  %v396_v4 = vrot.slane %v393_v58, 4 }
 0x117   : > { %456 = vst [vmem:[#allocation3 + $0x24] sm:$0x33] %v453_v57  ;;  %v358_v61 = vrot.slane %v355_v59, 4  ;;  %v3329_v57 = vld [vmem:[%s3832_s7 + $0x8] sm:$0xff] }
 0x119   : > { %v429_v63 = vpop.permute.xlu0 %428 }
 0x11a   : > { %v357_v60 = vpop.permute.xlu1 %356  ;;  %v432_v10 = vrot.slane %v429_v63, 4 }
 0x11b   : > { %v359_v62 = vrot.slane %v357_v60, 4  ;;  %368 = vst.msk [vmem:[#allocation3 + $0x8] sm:$0xc] %vm367_vm11, %v357_v60 }
 0x11d   : > { %v361_v1 = vsel %vm360_vm7, %v358_v61, %v359_v62  ;;  %v465_v7 = vpop.permute.xlu0 %464 }
 0x11e   : > { %v363_v2 = vsel %vm362_vm12, %v355_v59, %v361_v1  ;;  %v395_v3 = vpop.permute.xlu1 %394  ;;  %v468_v16 = vrot.slane %v465_v7, 4 }
 0x11f   : > { %366 = vst [vmem:[#allocation3] sm:$0xcc] %v363_v2  ;;  %v397_v5 = vrot.slane %v395_v3, 4  ;;  %404 = vst.msk [vmem:[#allocation3 + $0x14] sm:$0xc] %vm367_vm11, %v395_v3 }
 0x121   : > { %v398_v6 = vsel %vm360_vm7, %v396_v4, %v397_v5  ;;  %v482_v18 = vpop.permute.xlu0 %481 }
 0x122   : > { %v400_v8 = vsel %vm399_vm13, %v393_v58, %v398_v6  ;;  %v431_v9 = vpop.permute.xlu1 %430  ;;  %v485_v24 = vrot.slane %v482_v18, 4 }
 0x123   : > { %403 = vst [vmem:[#allocation3 + $0xc] sm:$0xcc] %v400_v8  ;;  %v433_v11 = vrot.slane %v431_v9, 4  ;;  %440 = vst.msk [vmem:[#allocation3 + $0x20] sm:$0xc] %vm367_vm11, %v431_v9 }
 0x125   : > { %v434_v12 = vsel %vm360_vm7, %v432_v10, %v433_v11 }
 0x126   : > { %v436_v13 = vsel %vm435_vm14, %v429_v63, %v434_v12  ;;  %v467_v14 = vpop.permute.xlu1 %466  ;;  %v3116_v15 = vld [vmem:[#allocation3 + $0x8] ss:$12 sps:$4 sm:$0xff]  }
 0x127   : > { %439 = vst [vmem:[#allocation3 + $0x18] sm:$0xcc] %v436_v13  ;;  %v469_v17 = vrot.slane %v467_v14, 4  ;;  %476 = vst.msk [vmem:[#allocation3 + $0x2c] sm:$0xc] %vm367_vm11, %v467_v14  ;;  %3001 = vmatpush3.bf16.msra.mxu1 %v3116_v15  ;;  %vm676_vm11 = vcmask 412672  }
 0x128   : > { %3002 = vmatprep.subr.bf16.mxu1 %v3177_v34 }
 0x129   : > { %v470_v19 = vsel %vm360_vm7, %v468_v16, %v469_v17 }
 0x12a   : > { %v472_v20 = vsel %vm471_vm15, %v465_v7, %v470_v19  ;;  %v484_v21 = vpop.permute.xlu1 %483  ;;  %v3117_v22 = vld [vmem:[#allocation3 + $0x4] ss:$12 sps:$4 sm:$0xff]   ;;  %v3119_v23 = vld [vmem:[#allocation3] ss:$12 sps:$4 sm:$0xff]  }
 0x12b   : > { %475 = vst [vmem:[#allocation3 + $0x24] sm:$0xcc] %v472_v20  ;;  %v486_v25 = vrot.slane %v484_v21, 4  ;;  %493 = vst.msk [vmem:[#allocation3 + $0x38] sm:$0x3] %vm346_vm5, %v484_v21  ;;  %562 = vmatprep.subr.bf16.mxu0 %v3117_v22  ;;  %vm673_vm5 = vcmask 1047556  }
 0x12c   : > { %563 = vmatpush1.bf16.msra.mxu0 %v3119_v23 }
 0x12d   : > { %v487_v26 = vsel %vm360_vm7, %v485_v24, %v486_v25 }
 0x12e   : > { %v489_v27 = vsel %vm488_vm0, %v482_v18, %v487_v26  ;;  %v3120_v28 = vld [vmem:[#allocation3 + $0x20] ss:$12 sps:$4 sm:$0xff]  }
 0x12f   : > { %492 = vst [vmem:[#allocation3 + $0x30] sm:$0x33] %v489_v27  ;;  %3003 = vmatpush3.bf16.msra.mxu1 %v3120_v28 }
 0x130   : > { %3004 = vmatprep.subr.bf16.mxu1 %v3177_v34 }
 0x132   : > { %v3121_v29 = vld [vmem:[#allocation3 + $0x1c] ss:$12 sps:$4 sm:$0xff]   ;;  %v3123_v30 = vld [vmem:[#allocation3 + $0x18] ss:$12 sps:$4 sm:$0xff]  }
 0x133   : > { %v3124_v31 = vld [vmem:[#allocation3 + $0x38] ss:$0 sps:$4 sm:$0x33]   ;;  %564 = vmatprep.subr.bf16.mxu0 %v3121_v29 }
 0x134   : > { %565 = vmatpush1.bf16.msra.mxu0 %v3123_v30  ;;  %v560_v32 = vsel %vm552_vm1, %v3124_v31, 0 }
 0x135   : > { %3005 = vmatpush3.bf16.msra.mxu1 %v560_v32 }
 0x136   : > { %v503_v33 = vld [vmem:[#allocation3 + $0x30] sm:$0x33]  ;;  %3010 = vmatprep.subr.bf16.mxu1 %v3177_v34 }
 0x137   : > { %v2819_v36 = vcombine.high %v503_v33, %v503_v33  ;;  %v2818_v37 = vcombine.low %v503_v33, %v503_v33 }
 0x138   : > { %3007 = vmatmul.mubr.msk.bf16.vlgmr.msra.gmra.mrb[0].mxu1 %vm548_vm3, %v494_v35 }
 0x139   : > { %2821 = vmatprep.subr.msk.bf16.mxu0 %vm552_vm1, %v2819_v36  ;;  %v554_v38 = vsel %vm552_vm1, %v2818_v37, 0  ;;  %3020 = vmatprep.mubr.msk.bf16.mxu1 %vm3179_vm6, %v3177_v34  ;;  %vm3337_vm1 = vmor %vm673_vm5, %vm672_vm4  ;;  %vm905_vm4 = vcmask 588800  }
 0x13a   : > { %567 = vmatpush1.bf16.msra.mxu0 %v554_v38 }
 0x13d   : > { %2822 = vmatmul.mubr.msk.bf16.vlgmr.msra.gmra.mrb[0].mxu0 %vm548_vm3, %v494_v35  ;;  %vm681_vm3 = vcmask 257024  }
 0x13e   : > { %951 = vmatprep.mubr.bf16.mxu0 %v3168_v0 }
 0x20b   : > { %v637_v40 = vpop.f32.mrb[0].mxu1 }
 0x20c   : > { %v3302_v41 = vadd.f32 %v637_v40, %v507_v39  ;;  %v3008_v42 = vpop.f32.mrb[1].mxu1 }
 0x20d   : > { %v640_v44 = vpop.f32.mrb[2].mxu1 }
 0x20e   : > { %v3009_v47 = vpop.f32.mrb[3].mxu1  ;;  %v648_v48 = vmax.f32 %v3302_v41, 0.0 }
 0x210   : > { %v596_v49 = vpop.f32.mrb[0].mxu0  ;;  %v651_v52 = vmul.f32 %v648_v48, %v3310_v45 }
 0x211   : > { %v3316_v50 = vadd.f32 %v596_v49, %v505_v43  ;;  %v598_v51 = vpop.f32.mrb[1].mxu0 }
 0x212   : > { %v3319_v53 = vadd.f32 %v598_v51, %v506_v46  ;;  %v600_v54 = vpop.f32.mrb[2].mxu0  ;;  %v2949_v59 = vpack.c.bf16 %v651_v52, %v651_v52 }
 0x213   : > { %v601_v56 = vpop.f32.mrb[3].mxu0  ;;  %v646_v58 = vmax.f32 %v3316_v50, 0.0 }
 0x214   : > { %v647_v60 = vmax.f32 %v3319_v53, 0.0  ;;  %665 = vrot.lane.b32.xlu1 %v2949_v59, %s3169_s11 }
 0x215   : > { %v649_v61 = vmul.f32 %v646_v58, %v3324_v55 }
 0x216   : > { %v650_v62 = vmul.f32 %v647_v60, %v3329_v57 }
 0x218   : > { %v2948_v63 = vpack.c.bf16 %v650_v62, %v649_v61 }
 0x21a   : > { %663 = vrot.lane.b32.xlu0 %v2948_v63, %s3169_s11 }
 0x286   : > { %v666_v2 = vpop.permute.xlu1 %665 }
 0x28c   : > { %v664_v1 = vpop.permute.xlu0 %663 }
 0x28d   : > { %v667_v3 = vrot.slane %v664_v1, 4 }
 0x28f   : > { %v668_v5 = vsel %vm332_vm2, %v667_v3, %v664_v1  ;;  %v669_v6 = vsel %vm332_vm2, %v667_v3, %v666_v2 }
 0x290   : > { %677 = vst.msk [vmem:[#allocation2 + $0x8] sm:$0xf] %vm676_vm11, %v669_v6 }
 0x291   : > { %675 = vst.msk [vmem:[#allocation2] sm:$0xff] %vm3337_vm1, %v668_v5 }
 0x297   : > { %v684_v7 = vld [vmem:[#allocation2 + $0x8] sm:$0xf] }
 0x298   : > { %v683_v8 = vld [vmem:[#allocation2] sm:$0xff]  ;;  %689 = vrot.lane.b32.xlu1 %v684_v7, %s3174_s16  ;;  %v679_v9 = vld [vmem:[#allocation2 + $0x8] sm:$0xf] }
 0x299   : > { %687 = vrot.lane.b32.xlu0 %v683_v8, %s3174_s16  ;;  %v700_v10 = vld [vmem:[#allocation2 + $0x8] sm:$0xf]  ;;  %682 = vst.msk [vmem:[#allocation3 + $0x8] sm:$0xf] %vm681_vm3, %v679_v9 }
 0x29a   : > { %v716_v11 = vld [vmem:[#allocation2 + $0x8] sm:$0xf] }
 0x29b   : > { %v732_v12 = vld [vmem:[#allocation2 + $0x8] sm:$0xf] }
 0x29c   : > { %705 = vrot.lane.b32.xlu1 %v700_v10, %s3170_s12  ;;  %v748_v13 = vld [vmem:[#allocation2 + $0x8] sm:$0xf] }
 0x29d   : > { %703 = vrot.lane.b32.xlu0 %v683_v8, %s3170_s12  ;;  %v764_v14 = vld [vmem:[#allocation2 + $0x8] sm:$0xf] }
 0x29e   : > { %v780_v15 = vld [vmem:[#allocation2 + $0x8] sm:$0xf] }
 0x29f   : > { %v796_v16 = vld [vmem:[#allocation2 + $0x8] sm:$0xf] }
 0x2a0   : > { %721 = vrot.lane.b32.xlu1 %v716_v11, %s3173_s15 }
 0x2a1   : > { %719 = vrot.lane.b32.xlu0 %v683_v8, %s3173_s15 }
 0x2a4   : > { %737 = vrot.lane.b32.xlu1 %v732_v12, %s3171_s13 }
 0x2a5   : > { %735 = vrot.lane.b32.xlu0 %v683_v8, %s3171_s13 }
 0x2a8   : > { %753 = vrot.lane.b32.xlu1 %v748_v13, %s3175_s17 }
 0x2a9   : > { %751 = vrot.lane.b32.xlu0 %v683_v8, %s3175_s17 }
 0x2ac   : > { %769 = vrot.lane.b32.xlu1 %v764_v14, %s3172_s14 }
 0x2ad   : > { %767 = vrot.lane.b32.xlu0 %v683_v8, %s3172_s14 }
 0x2b0   : > { %785 = vrot.lane.b32.xlu1 %v780_v15, %s3176_s18 }
 0x2b1   : > { %783 = vrot.lane.b32.xlu0 %v683_v8, %s3176_s18 }
 0x2b4   : > { %801 = vrot.lane.b32.xlu1 %v796_v16, %s3178_s19 }
 0x2b5   : > { %799 = vrot.lane.b32.xlu0 %v683_v8, %s3178_s19 }
 0x30a   : > { %v690_v17 = vpop.permute.xlu1 %689 }
 0x30b   : > { %v688_v18 = vpop.permute.xlu0 %687  ;;  %v692_v19 = vrot.slane %v690_v17, 4  ;;  %698 = vst.msk [vmem:[#allocation3 + $0x14] sm:$0xf] %vm681_vm3, %v690_v17 }
 0x30c   : > { %v691_v20 = vrot.slane %v688_v18, 4 }
 0x30e   : > { %v693_v21 = vsel %vm360_vm7, %v691_v20, %v692_v19  ;;  %v706_v23 = vpop.permute.xlu1 %705 }
 0x30f   : > { %v694_v22 = vsel %vm362_vm12, %v688_v18, %v693_v21  ;;  %v704_v24 = vpop.permute.xlu0 %703  ;;  %v708_v25 = vrot.slane %v706_v23, 4  ;;  %714 = vst.msk [vmem:[#allocation3 + $0x20] sm:$0xf] %vm681_vm3, %v706_v23 }
 0x310   : > { %v707_v26 = vrot.slane %v704_v24, 4  ;;  %v2827_v27 = vcombine.high %v683_v8, %v694_v22  ;;  %v2826_v28 = vcombine.low %v683_v8, %v694_v22 }
 0x312   : > { %919 = vmatprep.subr.bf16.mxu0 %v2827_v27  ;;  %v722_v29 = vpop.permute.xlu1 %721  ;;  %v3127_v31 = vld [vmem:[#allocation3 + $0x8] ss:$12 sps:$4 sm:$0xff]   ;;  %v709_v32 = vsel %vm360_vm7, %v707_v26, %v708_v25 }
 0x313   : > { %v720_v30 = vpop.permute.xlu0 %719  ;;  %920 = vmatpush1.bf16.msra.mxu0 %v2826_v28  ;;  %v724_v33 = vrot.slane %v722_v29, 4  ;;  %730 = vst.msk [vmem:[#allocation3 + $0x2c] sm:$0xf] %vm681_vm3, %v722_v29  ;;  %3011 = vmatpush3.bf16.msra.mxu1 %v3127_v31  ;;  %v710_v37 = vsel %vm380_vm8, %v704_v24, %v709_v32  ;;  %v811_v25 = vld [vmem:[%s3828_s3] sm:$0xf]  ;;  %v3411_v29 = vld [vmem:[%s3829_s4 + $0x8] sm:$0xff] }
 0x314   : > { %v723_v35 = vrot.slane %v720_v30, 4  ;;  %3012 = vmatprep.subr.bf16.mxu1 %v3177_v34  ;;  %v3406_v28 = vld [vmem:[%s3829_s4] sm:$0xff]  ;;  %v3417_v32 = vld [vmem:[%s3829_s4 + $0x10] sm:$0xff] }
 0x316   : > { %v725_v36 = vsel %vm360_vm7, %v723_v35, %v724_v33  ;;  %v738_v39 = vpop.permute.xlu1 %737 }
 0x317   : > { %v726_v38 = vsel %vm399_vm13, %v720_v30, %v725_v36  ;;  %v736_v40 = vpop.permute.xlu0 %735  ;;  %v740_v42 = vrot.slane %v738_v39, 4  ;;  %746 = vst.msk [vmem:[#allocation3 + $0x38] sm:$0xf] %vm681_vm3, %v738_v39 }
 0x318   : > { %v739_v43 = vrot.slane %v736_v40, 4  ;;  %v2830_v44 = vcombine.high %v710_v37, %v726_v38  ;;  %v2829_v46 = vcombine.low %v710_v37, %v726_v38 }
 0x31a   : > { %921 = vmatprep.subr.bf16.mxu0 %v2830_v44  ;;  %v754_v47 = vpop.permute.xlu1 %753  ;;  %v3128_v49 = vld [vmem:[#allocation3 + $0x20] ss:$12 sps:$4 sm:$0xff]   ;;  %v741_v51 = vsel %vm360_vm7, %v739_v43, %v740_v42 }
 0x31b   : > { %v752_v48 = vpop.permute.xlu0 %751  ;;  %922 = vmatpush1.bf16.msra.mxu0 %v2829_v46  ;;  %v756_v52 = vrot.slane %v754_v47, 4  ;;  %762 = vst.msk [vmem:[#allocation3 + $0x44] sm:$0xf] %vm681_vm3, %v754_v47  ;;  %3013 = vmatpush3.bf16.msra.mxu1 %v3128_v49  ;;  %v742_v58 = vsel %vm416_vm9, %v736_v40, %v741_v51 }
 0x31c   : > { %v755_v54 = vrot.slane %v752_v48, 4  ;;  %3014 = vmatprep.subr.bf16.mxu1 %v3177_v34 }
 0x31e   : > { %v757_v56 = vsel %vm360_vm7, %v755_v54, %v756_v52  ;;  %v770_v60 = vpop.permute.xlu1 %769 }
 0x31f   : > { %v758_v59 = vsel %vm435_vm14, %v752_v48, %v757_v56  ;;  %v768_v61 = vpop.permute.xlu0 %767  ;;  %v772_v62 = vrot.slane %v770_v60, 4  ;;  %778 = vst.msk [vmem:[#allocation3 + $0x50] sm:$0xf] %vm681_vm3, %v770_v60 }
 0x320   : > { %v771_v63 = vrot.slane %v768_v61, 4  ;;  %v2833_v1 = vcombine.high %v742_v58, %v758_v59  ;;  %v2832_v2 = vcombine.low %v742_v58, %v758_v59 }
 0x322   : > { %923 = vmatprep.subr.bf16.mxu0 %v2833_v1  ;;  %v786_v3 = vpop.permute.xlu1 %785  ;;  %v3129_v6 = vld [vmem:[#allocation3 + $0x38] ss:$12 sps:$4 sm:$0xff]   ;;  %v773_v7 = vsel %vm360_vm7, %v771_v63, %v772_v62 }
 0x323   : > { %v784_v5 = vpop.permute.xlu0 %783  ;;  %924 = vmatpush1.bf16.msra.mxu0 %v2832_v2  ;;  %v788_v8 = vrot.slane %v786_v3, 4  ;;  %794 = vst.msk [vmem:[#allocation3 + $0x5c] sm:$0xf] %vm681_vm3, %v786_v3  ;;  %3015 = vmatpush3.bf16.msra.mxu1 %v3129_v6  ;;  %v774_v11 = vsel %vm452_vm10, %v768_v61, %v773_v7 }
 0x324   : > { %v787_v9 = vrot.slane %v784_v5, 4  ;;  %3016 = vmatprep.subr.bf16.mxu1 %v3177_v34 }
 0x326   : > { %v789_v10 = vsel %vm360_vm7, %v787_v9, %v788_v8  ;;  %v802_v13 = vpop.permute.xlu1 %801 }
 0x327   : > { %v790_v12 = vsel %vm471_vm15, %v784_v5, %v789_v10  ;;  %v800_v14 = vpop.permute.xlu0 %799  ;;  %v804_v15 = vrot.slane %v802_v13, 4  ;;  %810 = vst.msk [vmem:[#allocation3 + $0x68] sm:$0xf] %vm681_vm3, %v802_v13 }
 0x328   : > { %v803_v16 = vrot.slane %v800_v14, 4  ;;  %v2836_v17 = vcombine.high %v774_v11, %v790_v12  ;;  %v2835_v18 = vcombine.low %v774_v11, %v790_v12 }
 0x32a   : > { %v805_v19 = vsel %vm360_vm7, %v803_v16, %v804_v15  ;;  %925 = vmatprep.subr.bf16.mxu0 %v2836_v17  ;;  %v3130_v21 = vld [vmem:[#allocation3 + $0x50] ss:$12 sps:$4 sm:$0xff]  }
 0x32b   : > { %v806_v20 = vsel %vm488_vm0, %v800_v14, %v805_v19  ;;  %926 = vmatpush1.bf16.msra.mxu0 %v2835_v18  ;;  %3017 = vmatpush3.bf16.msra.mxu1 %v3130_v21 }
 0x32c   : > { %v2839_v22 = vcombine.high %v806_v20, %v806_v20  ;;  %v2838_v23 = vcombine.low %v806_v20, %v806_v20  ;;  %3018 = vmatprep.subr.bf16.mxu1 %v3177_v34 }
 0x32e   : > { %2841 = vmatprep.subr.msk.bf16.mxu0 %vm360_vm7, %v2839_v22  ;;  %v911_v24 = vsel %vm360_vm7, %v2838_v23, 0  ;;  %v3131_v26 = vld [vmem:[#allocation3 + $0x68] ss:$0 sps:$4 sm:$0xff]  }
 0x32f   : > { %928 = vmatpush1.bf16.msra.mxu0 %v911_v24  ;;  %v917_v27 = vsel %vm360_vm7, %v3131_v26, 0 }
 0x330   : > { %3019 = vmatpush3.bf16.msra.mxu1 %v917_v27 }
 0x331   : > { %3024 = vmatprep.subr.bf16.mxu1 %v3177_v34 }
 0x332   : > { %2842 = vmatmul.mubr.msk.bf16.vlgmr.msra.gmra.mrb[4].mxu0 %vm905_vm4, %v811_v25 }
 0x333   : > { %1298 = vmatprep.mubr.bf16.mxu0 %v3168_v0  ;;  %3021 = vmatmul.mubr.msk.bf16.vlgmr.msra.gmra.mrb[4].mxu1 %vm905_vm4, %v811_v25 }
 0x334   : > { %3034 = vmatprep.mubr.msk.bf16.mxu1 %vm3179_vm6, %v3177_v34 }
 0x405   : > { %v953_v30 = vpop.f32.mrb[4].mxu0 }
 0x406   : > { %v954_v31 = vadd.f32 %v953_v30, %v3406_v28  ;;  %v955_v33 = vpop.f32.mrb[5].mxu0  ;;  %v994_v38 = vpop.f32.mrb[4].mxu1 }
 0x407   : > { %v956_v35 = vadd.f32 %v955_v33, %v3411_v29  ;;  %v957_v36 = vpop.f32.mrb[6].mxu0  ;;  %v995_v40 = vadd.f32 %v994_v38, %v3417_v32  ;;  %v3022_v43 = vpop.f32.mrb[5].mxu1 }
 0x408   : > { %v1000_v37 = vmax.f32 %v954_v31, 0.0  ;;  %v958_v39 = vpop.f32.mrb[7].mxu0  ;;  %v997_v46 = vpop.f32.mrb[6].mxu1 }
 0x409   : > { %v1001_v42 = vmax.f32 %v956_v35, 0.0  ;;  %v1002_v47 = vmax.f32 %v995_v40, 0.0  ;;  %v3023_v49 = vpop.f32.mrb[7].mxu1 }
 0x40a   : > { %v1003_v44 = vmul.f32 %v1000_v37, %v3324_v55 }
 0x40b   : > { %v1004_v48 = vmul.f32 %v1001_v42, %v3329_v57  ;;  %v1005_v51 = vmul.f32 %v1002_v47, %v3310_v45 }
 0x40d   : > { %v2950_v52 = vpack.c.bf16 %v1004_v48, %v1003_v44  ;;  %v2951_v54 = vpack.c.bf16 %v1005_v51, %v1005_v51 }
 0x40f   : > { %1017 = vrot.lane.b32.xlu0 %v2950_v52, %s3169_s11  ;;  %1019 = vrot.lane.b32.xlu1 %v2951_v54, %s3169_s11 }
 0x481   : > { %v1018_v56 = vpop.permute.xlu0 %1017  ;;  %v1020_v59 = vpop.permute.xlu1 %1019 }
 0x482   : > { %v1021_v58 = vrot.slane %v1018_v56, 4 }
 0x484   : > { %v1022_v60 = vsel %vm332_vm2, %v1021_v58, %v1018_v56  ;;  %v1023_v61 = vsel %vm332_vm2, %v1021_v58, %v1020_v59 }
 0x485   : > { %1026 = vst.msk [vmem:[#allocation2] sm:$0xff] %vm3337_vm1, %v1022_v60 }
 0x486   : > { %1027 = vst.msk [vmem:[#allocation2 + $0x8] sm:$0xf] %vm676_vm11, %v1023_v61 }
 0x48c   : > { %v1032_v63 = vld [vmem:[#allocation2] sm:$0xff] }
 0x48d   : > { %v1033_v62 = vld [vmem:[#allocation2 + $0x8] sm:$0xf]  ;;  %1036 = vrot.lane.b32.xlu0 %v1032_v63, %s3174_s16 }
 0x48e   : > { %1038 = vrot.lane.b32.xlu1 %v1033_v62, %s3174_s16  ;;  %v1029_v1 = vld [vmem:[#allocation2 + $0x8] sm:$0xf] }
 0x48f   : > { %v1049_v2 = vld [vmem:[#allocation2 + $0x8] sm:$0xf]  ;;  %1031 = vst.msk [vmem:[#allocation3 + $0x8] sm:$0xf] %vm681_vm3, %v1029_v1 }
 0x490   : > { %v1065_v3 = vld [vmem:[#allocation2 + $0x8] sm:$0xf] }
 0x491   : > { %1052 = vrot.lane.b32.xlu0 %v1032_v63, %s3170_s12  ;;  %v1081_v5 = vld [vmem:[#allocation2 + $0x8] sm:$0xf] }
 0x492   : > { %1054 = vrot.lane.b32.xlu1 %v1049_v2, %s3170_s12  ;;  %v1097_v6 = vld [vmem:[#allocation2 + $0x8] sm:$0xf] }
 0x493   : > { %v1113_v7 = vld [vmem:[#allocation2 + $0x8] sm:$0xf] }
 0x494   : > { %v1129_v8 = vld [vmem:[#allocation2 + $0x8] sm:$0xf] }
 0x495   : > { %1068 = vrot.lane.b32.xlu0 %v1032_v63, %s3173_s15  ;;  %v1145_v9 = vld [vmem:[#allocation2 + $0x8] sm:$0xf] }
 0x496   : > { %1070 = vrot.lane.b32.xlu1 %v1065_v3, %s3173_s15 }
 0x499   : > { %1084 = vrot.lane.b32.xlu0 %v1032_v63, %s3171_s13 }
 0x49a   : > { %1086 = vrot.lane.b32.xlu1 %v1081_v5, %s3171_s13 }
 0x49d   : > { %1100 = vrot.lane.b32.xlu0 %v1032_v63, %s3175_s17 }
 0x49e   : > { %1102 = vrot.lane.b32.xlu1 %v1097_v6, %s3175_s17 }
 0x4a1   : > { %1116 = vrot.lane.b32.xlu0 %v1032_v63, %s3172_s14 }
 0x4a2   : > { %1118 = vrot.lane.b32.xlu1 %v1113_v7, %s3172_s14 }
 0x4a5   : > { %1132 = vrot.lane.b32.xlu0 %v1032_v63, %s3176_s18 }
 0x4a6   : > { %1134 = vrot.lane.b32.xlu1 %v1129_v8, %s3176_s18 }
 0x4a9   : > { %1148 = vrot.lane.b32.xlu0 %v1032_v63, %s3178_s19 }
 0x4aa   : > { %1150 = vrot.lane.b32.xlu1 %v1145_v9, %s3178_s19 }
 0x4ff   : > { %v1037_v11 = vpop.permute.xlu0 %1036 }
 0x500   : > { %v1039_v10 = vpop.permute.xlu1 %1038  ;;  %v1040_v13 = vrot.slane %v1037_v11, 4 }
 0x501   : > { %v1041_v12 = vrot.slane %v1039_v10, 4  ;;  %1047 = vst.msk [vmem:[#allocation3 + $0x14] sm:$0xf] %vm681_vm3, %v1039_v10 }
 0x503   : > { %v1042_v14 = vsel %vm360_vm7, %v1040_v13, %v1041_v12  ;;  %v1053_v17 = vpop.permute.xlu0 %1052 }
 0x504   : > { %v1043_v15 = vsel %vm362_vm12, %v1037_v11, %v1042_v14  ;;  %v1055_v16 = vpop.permute.xlu1 %1054  ;;  %v1056_v19 = vrot.slane %v1053_v17, 4 }
 0x505   : > { %v1057_v18 = vrot.slane %v1055_v16, 4  ;;  %1063 = vst.msk [vmem:[#allocation3 + $0x20] sm:$0xf] %vm681_vm3, %v1055_v16  ;;  %v2847_v20 = vcombine.high %v1032_v63, %v1043_v15  ;;  %v2846_v21 = vcombine.low %v1032_v63, %v1043_v15 }
 0x507   : > { %1266 = vmatprep.subr.bf16.mxu0 %v2847_v20  ;;  %v1069_v23 = vpop.permute.xlu0 %1068  ;;  %v1058_v25 = vsel %vm360_vm7, %v1056_v19, %v1057_v18 }
 0x508   : > { %v1071_v22 = vpop.permute.xlu1 %1070  ;;  %v3132_v24 = vld [vmem:[#allocation3 + $0x8] ss:$12 sps:$4 sm:$0xff]   ;;  %1267 = vmatpush1.bf16.msra.mxu0 %v2846_v21  ;;  %v1072_v27 = vrot.slane %v1069_v23, 4  ;;  %v1059_v31 = vsel %vm380_vm8, %v1053_v17, %v1058_v25  ;;  %v3496_v25 = vld [vmem:[%s3831_s6 + $0x8] sm:$0xff] }
 0x509   : > { %v1073_v26 = vrot.slane %v1071_v22, 4  ;;  %1079 = vst.msk [vmem:[#allocation3 + $0x2c] sm:$0xf] %vm681_vm3, %v1071_v22  ;;  %3025 = vmatpush3.bf16.msra.mxu1 %v3132_v24  ;;  %v1160_v22 = vld [vmem:[%s3830_s5] sm:$0xf] }
 0x50a   : > { %3026 = vmatprep.subr.bf16.mxu1 %v3177_v34  ;;  %v3491_v24 = vld [vmem:[%s3831_s6] sm:$0xff] }
 0x50b   : > { %v1074_v30 = vsel %vm360_vm7, %v1072_v27, %v1073_v26  ;;  %v1085_v36 = vpop.permute.xlu0 %1084  ;;  %v3501_v27 = vld [vmem:[%s3831_s6 + $0x10] sm:$0xff] }
 0x50c   : > { %v1075_v33 = vsel %vm399_vm13, %v1069_v23, %v1074_v30  ;;  %v1087_v35 = vpop.permute.xlu1 %1086  ;;  %v1088_v38 = vrot.slane %v1085_v36, 4 }
 0x50d   : > { %v1089_v37 = vrot.slane %v1087_v35, 4  ;;  %1095 = vst.msk [vmem:[#allocation3 + $0x38] sm:$0xf] %vm681_vm3, %v1087_v35  ;;  %v2850_v39 = vcombine.high %v1059_v31, %v1075_v33  ;;  %v2849_v40 = vcombine.low %v1059_v31, %v1075_v33 }
 0x50f   : > { %1268 = vmatprep.subr.bf16.mxu0 %v2850_v39  ;;  %v1101_v43 = vpop.permute.xlu0 %1100  ;;  %v1090_v46 = vsel %vm360_vm7, %v1088_v38, %v1089_v37 }
 0x510   : > { %v1103_v42 = vpop.permute.xlu1 %1102  ;;  %v3133_v44 = vld [vmem:[#allocation3 + $0x20] ss:$12 sps:$4 sm:$0xff]   ;;  %1269 = vmatpush1.bf16.msra.mxu0 %v2849_v40  ;;  %v1104_v48 = vrot.slane %v1101_v43, 4  ;;  %v1091_v51 = vsel %vm416_vm9, %v1085_v36, %v1090_v46 }
 0x511   : > { %v1105_v47 = vrot.slane %v1103_v42, 4  ;;  %1111 = vst.msk [vmem:[#allocation3 + $0x44] sm:$0xf] %vm681_vm3, %v1103_v42  ;;  %3027 = vmatpush3.bf16.msra.mxu1 %v3133_v44 }
 0x512   : > { %3028 = vmatprep.subr.bf16.mxu1 %v3177_v34 }
 0x513   : > { %v1106_v49 = vsel %vm360_vm7, %v1104_v48, %v1105_v47  ;;  %v1117_v56 = vpop.permute.xlu0 %1116 }
 0x514   : > { %v1107_v52 = vsel %vm435_vm14, %v1101_v43, %v1106_v49  ;;  %v1119_v54 = vpop.permute.xlu1 %1118  ;;  %v1120_v59 = vrot.slane %v1117_v56, 4 }
 0x515   : > { %v1121_v58 = vrot.slane %v1119_v54, 4  ;;  %1127 = vst.msk [vmem:[#allocation3 + $0x50] sm:$0xf] %vm681_vm3, %v1119_v54  ;;  %v2853_v60 = vcombine.high %v1091_v51, %v1107_v52  ;;  %v2852_v61 = vcombine.low %v1091_v51, %v1107_v52 }
 0x517   : > { %1270 = vmatprep.subr.bf16.mxu0 %v2853_v60  ;;  %v1133_v63 = vpop.permute.xlu0 %1132  ;;  %v1122_v2 = vsel %vm360_vm7, %v1120_v59, %v1121_v58 }
 0x518   : > { %v1135_v62 = vpop.permute.xlu1 %1134  ;;  %v3134_v1 = vld [vmem:[#allocation3 + $0x38] ss:$12 sps:$4 sm:$0xff]   ;;  %1271 = vmatpush1.bf16.msra.mxu0 %v2852_v61  ;;  %v1136_v5 = vrot.slane %v1133_v63, 4  ;;  %v1123_v7 = vsel %vm452_vm10, %v1117_v56, %v1122_v2 }
 0x519   : > { %v1137_v3 = vrot.slane %v1135_v62, 4  ;;  %1143 = vst.msk [vmem:[#allocation3 + $0x5c] sm:$0xf] %vm681_vm3, %v1135_v62  ;;  %3029 = vmatpush3.bf16.msra.mxu1 %v3134_v1 }
 0x51a   : > { %3030 = vmatprep.subr.bf16.mxu1 %v3177_v34 }
 0x51b   : > { %v1138_v6 = vsel %vm360_vm7, %v1136_v5, %v1137_v3  ;;  %v1149_v10 = vpop.permute.xlu0 %1148 }
 0x51c   : > { %v1139_v8 = vsel %vm471_vm15, %v1133_v63, %v1138_v6  ;;  %v1151_v9 = vpop.permute.xlu1 %1150  ;;  %v1152_v12 = vrot.slane %v1149_v10, 4 }
 0x51d   : > { %v1153_v11 = vrot.slane %v1151_v9, 4  ;;  %1159 = vst.msk [vmem:[#allocation3 + $0x68] sm:$0xf] %vm681_vm3, %v1151_v9  ;;  %v2856_v13 = vcombine.high %v1123_v7, %v1139_v8  ;;  %v2855_v14 = vcombine.low %v1123_v7, %v1139_v8 }
 0x51f   : > { %v1154_v15 = vsel %vm360_vm7, %v1152_v12, %v1153_v11  ;;  %1272 = vmatprep.subr.bf16.mxu0 %v2856_v13 }
 0x520   : > { %v1155_v16 = vsel %vm488_vm0, %v1149_v10, %v1154_v15  ;;  %v3135_v17 = vld [vmem:[#allocation3 + $0x50] ss:$12 sps:$4 sm:$0xff]   ;;  %1273 = vmatpush1.bf16.msra.mxu0 %v2855_v14 }
 0x521   : > { %v2859_v18 = vcombine.high %v1155_v16, %v1155_v16  ;;  %v2858_v19 = vcombine.low %v1155_v16, %v1155_v16  ;;  %3031 = vmatpush3.bf16.msra.mxu1 %v3135_v17 }
 0x522   : > { %3032 = vmatprep.subr.bf16.mxu1 %v3177_v34 }
 0x523   : > { %2861 = vmatprep.subr.msk.bf16.mxu0 %vm360_vm7, %v2859_v18  ;;  %v1258_v20 = vsel %vm360_vm7, %v2858_v19, 0 }
 0x524   : > { %v3136_v21 = vld [vmem:[#allocation3 + $0x68] ss:$0 sps:$4 sm:$0xff]   ;;  %1275 = vmatpush1.bf16.msra.mxu0 %v1258_v20 }
 0x525   : > { %v1264_v23 = vsel %vm360_vm7, %v3136_v21, 0 }
 0x526   : > { %3033 = vmatpush3.bf16.msra.mxu1 %v1264_v23 }
 0x527   : > { %2862 = vmatmul.mubr.msk.bf16.vlgmr.msra.gmra.mrb[8].mxu0 %vm905_vm4, %v1160_v22  ;;  %3038 = vmatprep.subr.bf16.mxu1 %v3177_v34 }
 0x528   : > { %1648 = vmatprep.mubr.bf16.mxu0 %v3168_v0 }
 0x529   : > { %3035 = vmatmul.mubr.msk.bf16.vlgmr.msra.gmra.mrb[8].mxu1 %vm905_vm4, %v1160_v22 }
 0x52a   : > { %3048 = vmatprep.mubr.msk.bf16.mxu1 %vm3179_vm6, %v3177_v34 }
 0x5fa   : > { %v1300_v26 = vpop.f32.mrb[8].mxu0 }
 0x5fb   : > { %v1301_v30 = vadd.f32 %v1300_v26, %v3491_v24  ;;  %v1302_v31 = vpop.f32.mrb[9].mxu0 }
 0x5fc   : > { %v1303_v33 = vadd.f32 %v1302_v31, %v3496_v25  ;;  %v1304_v35 = vpop.f32.mrb[10].mxu0  ;;  %v1341_v36 = vpop.f32.mrb[8].mxu1 }
 0x5fd   : > { %v1347_v37 = vadd.f32 %v1301_v30, %v3316_v50  ;;  %v1305_v38 = vpop.f32.mrb[11].mxu0  ;;  %v1342_v39 = vadd.f32 %v1341_v36, %v3501_v27  ;;  %v3036_v42 = vpop.f32.mrb[9].mxu1 }
 0x5fe   : > { %v1348_v40 = vadd.f32 %v1303_v33, %v3319_v53  ;;  %v1344_v44 = vpop.f32.mrb[10].mxu1 }
 0x5ff   : > { %v1350_v43 = vmax.f32 %v1347_v37, 0.0  ;;  %v1349_v46 = vadd.f32 %v1342_v39, %v3302_v41  ;;  %v3037_v48 = vpop.f32.mrb[11].mxu1 }
 0x600   : > { %v1351_v47 = vmax.f32 %v1348_v40, 0.0 }
 0x601   : > { %v1353_v49 = vmul.f32 %v1350_v43, %v3324_v55  ;;  %v1352_v51 = vmax.f32 %v1349_v46, 0.0 }
 0x602   : > { %v1354_v52 = vmul.f32 %v1351_v47, %v3329_v57 }
 0x603   : > { %v1355_v54 = vmul.f32 %v1352_v51, %v3310_v45 }
 0x604   : > { %v2952_v56 = vpack.c.bf16 %v1354_v52, %v1353_v49 }
 0x605   : > { %v2953_v58 = vpack.c.bf16 %v1355_v54, %v1355_v54 }
 0x606   : > { %1367 = vrot.lane.b32.xlu0 %v2952_v56, %s3169_s11 }
 0x607   : > { %1369 = vrot.lane.b32.xlu1 %v2953_v58, %s3169_s11 }
 0x678   : > { %v1368_v59 = vpop.permute.xlu0 %1367 }
 0x679   : > { %v1371_v60 = vrot.slane %v1368_v59, 4  ;;  %v1370_v61 = vpop.permute.xlu1 %1369 }
 0x67b   : > { %v1372_v62 = vsel %vm332_vm2, %v1371_v60, %v1368_v59  ;;  %v1373_v63 = vsel %vm332_vm2, %v1371_v60, %v1370_v61 }
 0x67c   : > { %1376 = vst.msk [vmem:[#allocation2] sm:$0xff] %vm3337_vm1, %v1372_v62 }
 0x67d   : > { %1377 = vst.msk [vmem:[#allocation2 + $0x8] sm:$0xf] %vm676_vm11, %v1373_v63 }
 0x683   : > { %v1382_v45 = vld [vmem:[#allocation2] sm:$0xff] }
 0x684   : > { %v1383_v1 = vld [vmem:[#allocation2 + $0x8] sm:$0xf]  ;;  %1386 = vrot.lane.b32.xlu0 %v1382_v45, %s3174_s16 }
 0x685   : > { %1388 = vrot.lane.b32.xlu1 %v1383_v1, %s3174_s16  ;;  %v1379_v2 = vld [vmem:[#allocation2 + $0x8] sm:$0xf] }
 0x686   : > { %v1399_v3 = vld [vmem:[#allocation2 + $0x8] sm:$0xf]  ;;  %1381 = vst.msk [vmem:[#allocation3 + $0x8] sm:$0xf] %vm681_vm3, %v1379_v2 }
 0x687   : > { %v1415_v5 = vld [vmem:[#allocation2 + $0x8] sm:$0xf] }
 0x688   : > { %1402 = vrot.lane.b32.xlu0 %v1382_v45, %s3170_s12  ;;  %v1431_v6 = vld [vmem:[#allocation2 + $0x8] sm:$0xf] }
 0x689   : > { %1404 = vrot.lane.b32.xlu1 %v1399_v3, %s3170_s12  ;;  %v1447_v7 = vld [vmem:[#allocation2 + $0x8] sm:$0xf] }
 0x68a   : > { %v1463_v8 = vld [vmem:[#allocation2 + $0x8] sm:$0xf] }
 0x68b   : > { %v1479_v9 = vld [vmem:[#allocation2 + $0x8] sm:$0xf] }
 0x68c   : > { %1418 = vrot.lane.b32.xlu0 %v1382_v45, %s3173_s15  ;;  %v1495_v10 = vld [vmem:[#allocation2 + $0x8] sm:$0xf] }
 0x68d   : > { %1420 = vrot.lane.b32.xlu1 %v1415_v5, %s3173_s15 }
 0x690   : > { %1434 = vrot.lane.b32.xlu0 %v1382_v45, %s3171_s13 }
 0x691   : > { %1436 = vrot.lane.b32.xlu1 %v1431_v6, %s3171_s13 }
 0x694   : > { %1450 = vrot.lane.b32.xlu0 %v1382_v45, %s3175_s17 }
 0x695   : > { %1452 = vrot.lane.b32.xlu1 %v1447_v7, %s3175_s17 }
 0x698   : > { %1466 = vrot.lane.b32.xlu0 %v1382_v45, %s3172_s14 }
 0x699   : > { %1468 = vrot.lane.b32.xlu1 %v1463_v8, %s3172_s14 }
 0x69c   : > { %1482 = vrot.lane.b32.xlu0 %v1382_v45, %s3176_s18 }
 0x69d   : > { %1484 = vrot.lane.b32.xlu1 %v1479_v9, %s3176_s18 }
 0x6a0   : > { %1498 = vrot.lane.b32.xlu0 %v1382_v45, %s3178_s19 }
 0x6a1   : > { %1500 = vrot.lane.b32.xlu1 %v1495_v10, %s3178_s19 }
 0x6f6   : > { %v1387_v12 = vpop.permute.xlu0 %1386 }
 0x6f7   : > { %v1389_v11 = vpop.permute.xlu1 %1388  ;;  %v1390_v14 = vrot.slane %v1387_v12, 4 }
 0x6f8   : > { %v1391_v13 = vrot.slane %v1389_v11, 4  ;;  %1397 = vst.msk [vmem:[#allocation3 + $0x14] sm:$0xf] %vm681_vm3, %v1389_v11 }
 0x6fa   : > { %v1392_v15 = vsel %vm360_vm7, %v1390_v14, %v1391_v13  ;;  %v1403_v18 = vpop.permute.xlu0 %1402 }
 0x6fb   : > { %v1393_v16 = vsel %vm362_vm12, %v1387_v12, %v1392_v15  ;;  %v1405_v17 = vpop.permute.xlu1 %1404  ;;  %v1406_v20 = vrot.slane %v1403_v18, 4 }
 0x6fc   : > { %v1407_v19 = vrot.slane %v1405_v17, 4  ;;  %1413 = vst.msk [vmem:[#allocation3 + $0x20] sm:$0xf] %vm681_vm3, %v1405_v17  ;;  %v2867_v21 = vcombine.high %v1382_v45, %v1393_v16  ;;  %v2866_v22 = vcombine.low %v1382_v45, %v1393_v16 }
 0x6fe   : > { %1616 = vmatprep.subr.bf16.mxu0 %v2867_v21  ;;  %v1419_v26 = vpop.permute.xlu0 %1418  ;;  %v1408_v31 = vsel %vm360_vm7, %v1406_v20, %v1407_v19 }
 0x6ff   : > { %v1421_v23 = vpop.permute.xlu1 %1420  ;;  %v3137_v30 = vld [vmem:[#allocation3 + $0x8] ss:$12 sps:$4 sm:$0xff]   ;;  %1617 = vmatpush1.bf16.msra.mxu0 %v2866_v22  ;;  %v1422_v35 = vrot.slane %v1419_v26, 4  ;;  %v1409_v37 = vsel %vm380_vm8, %v1403_v18, %v1408_v31 }
 0x700   : > { %v1423_v33 = vrot.slane %v1421_v23, 4  ;;  %1429 = vst.msk [vmem:[#allocation3 + $0x2c] sm:$0xf] %vm681_vm3, %v1421_v23  ;;  %3039 = vmatpush3.bf16.msra.mxu1 %v3137_v30  ;;  %v1510_v30 = vld [vmem:[%s3828_s3] sm:$0xf] }
 0x701   : > { %3040 = vmatprep.subr.bf16.mxu1 %v3177_v34 }
 0x702   : > { %v1424_v36 = vsel %vm360_vm7, %v1422_v35, %v1423_v33  ;;  %v1435_v40 = vpop.permute.xlu0 %1434 }
 0x703   : > { %v1425_v38 = vsel %vm399_vm13, %v1419_v26, %v1424_v36  ;;  %v1437_v39 = vpop.permute.xlu1 %1436  ;;  %v1438_v43 = vrot.slane %v1435_v40, 4 }
 0x704   : > { %v1439_v42 = vrot.slane %v1437_v39, 4  ;;  %1445 = vst.msk [vmem:[#allocation3 + $0x38] sm:$0xf] %vm681_vm3, %v1437_v39  ;;  %v2870_v44 = vcombine.high %v1409_v37, %v1425_v38  ;;  %v2869_v46 = vcombine.low %v1409_v37, %v1425_v38 }
 0x706   : > { %1618 = vmatprep.subr.bf16.mxu0 %v2870_v44  ;;  %v1451_v48 = vpop.permute.xlu0 %1450  ;;  %v1440_v51 = vsel %vm360_vm7, %v1438_v43, %v1439_v42 }
 0x707   : > { %v1453_v47 = vpop.permute.xlu1 %1452  ;;  %v3138_v49 = vld [vmem:[#allocation3 + $0x20] ss:$12 sps:$4 sm:$0xff]   ;;  %1619 = vmatpush1.bf16.msra.mxu0 %v2869_v46  ;;  %v1454_v54 = vrot.slane %v1451_v48, 4  ;;  %v1441_v58 = vsel %vm416_vm9, %v1435_v40, %v1440_v51 }
 0x708   : > { %v1455_v52 = vrot.slane %v1453_v47, 4  ;;  %1461 = vst.msk [vmem:[#allocation3 + $0x44] sm:$0xf] %vm681_vm3, %v1453_v47  ;;  %3041 = vmatpush3.bf16.msra.mxu1 %v3138_v49 }
 0x709   : > { %3042 = vmatprep.subr.bf16.mxu1 %v3177_v34 }
 0x70a   : > { %v1456_v56 = vsel %vm360_vm7, %v1454_v54, %v1455_v52  ;;  %v1467_v61 = vpop.permute.xlu0 %1466 }
 0x70b   : > { %v1457_v59 = vsel %vm435_vm14, %v1451_v48, %v1456_v56  ;;  %v1469_v60 = vpop.permute.xlu1 %1468  ;;  %v1470_v63 = vrot.slane %v1467_v61, 4 }
 0x70c   : > { %v1471_v62 = vrot.slane %v1469_v60, 4  ;;  %1477 = vst.msk [vmem:[#allocation3 + $0x50] sm:$0xf] %vm681_vm3, %v1469_v60  ;;  %v2873_v1 = vcombine.high %v1441_v58, %v1457_v59  ;;  %v2872_v45 = vcombine.low %v1441_v58, %v1457_v59 }
 0x70e   : > { %1620 = vmatprep.subr.bf16.mxu0 %v2873_v1  ;;  %v1483_v3 = vpop.permute.xlu0 %1482  ;;  %v1472_v6 = vsel %vm360_vm7, %v1470_v63, %v1471_v62 }
 0x70f   : > { %v1485_v2 = vpop.permute.xlu1 %1484  ;;  %v3139_v5 = vld [vmem:[#allocation3 + $0x38] ss:$12 sps:$4 sm:$0xff]   ;;  %1621 = vmatpush1.bf16.msra.mxu0 %v2872_v45  ;;  %v1486_v8 = vrot.slane %v1483_v3, 4  ;;  %v1473_v10 = vsel %vm452_vm10, %v1467_v61, %v1472_v6 }
 0x710   : > { %v1487_v7 = vrot.slane %v1485_v2, 4  ;;  %1493 = vst.msk [vmem:[#allocation3 + $0x5c] sm:$0xf] %vm681_vm3, %v1485_v2  ;;  %3043 = vmatpush3.bf16.msra.mxu1 %v3139_v5 }
 0x711   : > { %3044 = vmatprep.subr.bf16.mxu1 %v3177_v34 }
 0x712   : > { %v1488_v9 = vsel %vm360_vm7, %v1486_v8, %v1487_v7  ;;  %v1499_v13 = vpop.permute.xlu0 %1498 }
 0x713   : > { %v1489_v11 = vsel %vm471_vm15, %v1483_v3, %v1488_v9  ;;  %v1501_v12 = vpop.permute.xlu1 %1500  ;;  %v1502_v15 = vrot.slane %v1499_v13, 4 }
 0x714   : > { %v1503_v14 = vrot.slane %v1501_v12, 4  ;;  %1509 = vst.msk [vmem:[#allocation3 + $0x68] sm:$0xf] %vm681_vm3, %v1501_v12  ;;  %v2876_v16 = vcombine.high %v1473_v10, %v1489_v11  ;;  %v2875_v17 = vcombine.low %v1473_v10, %v1489_v11 }
 0x716   : > { %v1504_v18 = vsel %vm360_vm7, %v1502_v15, %v1503_v14  ;;  %1622 = vmatprep.subr.bf16.mxu0 %v2876_v16 }
 0x717   : > { %v1505_v19 = vsel %vm488_vm0, %v1499_v13, %v1504_v18  ;;  %v3140_v20 = vld [vmem:[#allocation3 + $0x50] ss:$12 sps:$4 sm:$0xff]   ;;  %1623 = vmatpush1.bf16.msra.mxu0 %v2875_v17 }
 0x718   : > { %v2879_v21 = vcombine.high %v1505_v19, %v1505_v19  ;;  %v2878_v22 = vcombine.low %v1505_v19, %v1505_v19  ;;  %3045 = vmatpush3.bf16.msra.mxu1 %v3140_v20 }
 0x719   : > { %3046 = vmatprep.subr.bf16.mxu1 %v3177_v34 }
 0x71a   : > { %2881 = vmatprep.subr.msk.bf16.mxu0 %vm360_vm7, %v2879_v21  ;;  %v1608_v23 = vsel %vm360_vm7, %v2878_v22, 0 }
 0x71b   : > { %v3141_v26 = vld [vmem:[#allocation3 + $0x68] ss:$0 sps:$4 sm:$0xff]   ;;  %1625 = vmatpush1.bf16.msra.mxu0 %v1608_v23 }
 0x71c   : > { %v1614_v31 = vsel %vm360_vm7, %v3141_v26, 0 }
 0x71d   : > { %3047 = vmatpush3.bf16.msra.mxu1 %v1614_v31 }
 0x71e   : > { %2882 = vmatmul.mubr.msk.bf16.vlgmr.msra.gmra.mrb[12].mxu0 %vm905_vm4, %v1510_v30  ;;  %3052 = vmatprep.subr.bf16.mxu1 %v3177_v34 }
 0x71f   : > { %1995 = vmatprep.mubr.bf16.mxu0 %v3168_v0 }
 0x720   : > { %3049 = vmatmul.mubr.msk.bf16.vlgmr.msra.gmra.mrb[12].mxu1 %vm905_vm4, %v1510_v30 }
 0x721   : > { %3062 = vmatprep.mubr.msk.bf16.mxu1 %vm3179_vm6, %v3177_v34 }
 0x7f1   : > { %v1650_v33 = vpop.f32.mrb[12].mxu0 }
 0x7f2   : > { %v1651_v35 = vadd.f32 %v1650_v33, %v3406_v28  ;;  %v1652_v36 = vpop.f32.mrb[13].mxu0  ;;  %v3584_v28 = vld [vmem:[%s3832_s7 + $0x10] sm:$0xff] }
 0x7f3   : > { %v1653_v37 = vadd.f32 %v1652_v36, %v3411_v29  ;;  %v1654_v38 = vpop.f32.mrb[14].mxu0  ;;  %v1691_v40 = vpop.f32.mrb[12].mxu1 }
 0x7f4   : > { %v1697_v39 = vmax.f32 %v1651_v35, 0.0  ;;  %v1655_v42 = vpop.f32.mrb[15].mxu0  ;;  %v1692_v43 = vadd.f32 %v1691_v40, %v3417_v32  ;;  %v3050_v46 = vpop.f32.mrb[13].mxu1 }
 0x7f5   : > { %v1698_v44 = vmax.f32 %v1653_v37, 0.0  ;;  %v1694_v48 = vpop.f32.mrb[14].mxu1 }
 0x7f6   : > { %v1700_v47 = vmul.f32 %v1697_v39, %v3324_v55  ;;  %v1699_v49 = vmax.f32 %v1692_v43, 0.0  ;;  %v3051_v52 = vpop.f32.mrb[15].mxu1 }
 0x7f7   : > { %v1701_v51 = vmul.f32 %v1698_v44, %v3329_v57 }
 0x7f8   : > { %v1702_v29 = vmul.f32 %v3584_v28, %v1699_v49 }
 0x7f9   : > { %v2954_v54 = vpack.c.bf16 %v1701_v51, %v1700_v47 }
 0x7fa   : > { %v2955_v56 = vpack.c.bf16 %v1702_v29, %v1702_v29 }
 0x7fb   : > { %1714 = vrot.lane.b32.xlu0 %v2954_v54, %s3169_s11 }
 0x7fc   : > { %1716 = vrot.lane.b32.xlu1 %v2955_v56, %s3169_s11 }
 0x86d   : > { %v1715_v32 = vpop.permute.xlu0 %1714 }
 0x86e   : > { %v1718_v55 = vrot.slane %v1715_v32, 4  ;;  %v1717_v58 = vpop.permute.xlu1 %1716 }
 0x870   : > { %v1719_v59 = vsel %vm332_vm2, %v1718_v55, %v1715_v32  ;;  %v1720_v57 = vsel %vm332_vm2, %v1718_v55, %v1717_v58 }
 0x871   : > { %1723 = vst.msk [vmem:[#allocation2] sm:$0xff] %vm3337_vm1, %v1719_v59 }
 0x872   : > { %1724 = vst.msk [vmem:[#allocation2 + $0x8] sm:$0xf] %vm676_vm11, %v1720_v57 }
 0x878   : > { %v1729_v61 = vld [vmem:[#allocation2] sm:$0xff] }
 0x879   : > { %v1730_v60 = vld [vmem:[#allocation2 + $0x8] sm:$0xf]  ;;  %1733 = vrot.lane.b32.xlu0 %v1729_v61, %s3174_s16 }
 0x87a   : > { %1735 = vrot.lane.b32.xlu1 %v1730_v60, %s3174_s16  ;;  %v1726_v62 = vld [vmem:[#allocation2 + $0x8] sm:$0xf] }
 0x87b   : > { %v1746_v63 = vld [vmem:[#allocation2 + $0x8] sm:$0xf]  ;;  %1728 = vst.msk [vmem:[#allocation3 + $0x8] sm:$0xf] %vm681_vm3, %v1726_v62 }
 0x87c   : > { %v1762_v1 = vld [vmem:[#allocation2 + $0x8] sm:$0xf] }
 0x87d   : > { %1749 = vrot.lane.b32.xlu0 %v1729_v61, %s3170_s12  ;;  %v1778_v45 = vld [vmem:[#allocation2 + $0x8] sm:$0xf] }
 0x87e   : > { %1751 = vrot.lane.b32.xlu1 %v1746_v63, %s3170_s12  ;;  %v1794_v2 = vld [vmem:[#allocation2 + $0x8] sm:$0xf] }
 0x87f   : > { %v1810_v3 = vld [vmem:[#allocation2 + $0x8] sm:$0xf] }
 0x880   : > { %v1826_v5 = vld [vmem:[#allocation2 + $0x8] sm:$0xf] }
 0x881   : > { %1765 = vrot.lane.b32.xlu0 %v1729_v61, %s3173_s15  ;;  %v1842_v6 = vld [vmem:[#allocation2 + $0x8] sm:$0xf] }
 0x882   : > { %1767 = vrot.lane.b32.xlu1 %v1762_v1, %s3173_s15 }
 0x885   : > { %1781 = vrot.lane.b32.xlu0 %v1729_v61, %s3171_s13 }
 0x886   : > { %1783 = vrot.lane.b32.xlu1 %v1778_v45, %s3171_s13 }
 0x889   : > { %1797 = vrot.lane.b32.xlu0 %v1729_v61, %s3175_s17 }
 0x88a   : > { %1799 = vrot.lane.b32.xlu1 %v1794_v2, %s3175_s17 }
 0x88d   : > { %1813 = vrot.lane.b32.xlu0 %v1729_v61, %s3172_s14 }
 0x88e   : > { %1815 = vrot.lane.b32.xlu1 %v1810_v3, %s3172_s14 }
 0x891   : > { %1829 = vrot.lane.b32.xlu0 %v1729_v61, %s3176_s18 }
 0x892   : > { %1831 = vrot.lane.b32.xlu1 %v1826_v5, %s3176_s18 }
 0x895   : > { %1845 = vrot.lane.b32.xlu0 %v1729_v61, %s3178_s19 }
 0x896   : > { %1847 = vrot.lane.b32.xlu1 %v1842_v6, %s3178_s19 }
 0x8eb   : > { %v1734_v8 = vpop.permute.xlu0 %1733 }
 0x8ec   : > { %v1736_v7 = vpop.permute.xlu1 %1735  ;;  %v1737_v10 = vrot.slane %v1734_v8, 4 }
 0x8ed   : > { %v1738_v9 = vrot.slane %v1736_v7, 4  ;;  %1744 = vst.msk [vmem:[#allocation3 + $0x14] sm:$0xf] %vm681_vm3, %v1736_v7 }
 0x8ef   : > { %v1739_v11 = vsel %vm360_vm7, %v1737_v10, %v1738_v9  ;;  %v1750_v14 = vpop.permute.xlu0 %1749 }
 0x8f0   : > { %v1740_v12 = vsel %vm362_vm12, %v1734_v8, %v1739_v11  ;;  %v1752_v13 = vpop.permute.xlu1 %1751  ;;  %v1753_v16 = vrot.slane %v1750_v14, 4 }
 0x8f1   : > { %v1754_v15 = vrot.slane %v1752_v13, 4  ;;  %1760 = vst.msk [vmem:[#allocation3 + $0x20] sm:$0xf] %vm681_vm3, %v1752_v13  ;;  %v2887_v17 = vcombine.high %v1729_v61, %v1740_v12  ;;  %v2886_v18 = vcombine.low %v1729_v61, %v1740_v12 }
 0x8f3   : > { %1963 = vmatprep.subr.bf16.mxu0 %v2887_v17  ;;  %v1766_v20 = vpop.permute.xlu0 %1765  ;;  %v1755_v22 = vsel %vm360_vm7, %v1753_v16, %v1754_v15  ;;  %v1857_v17 = vld [vmem:[%s3830_s5] sm:$0xf] }
 0x8f4   : > { %v1768_v19 = vpop.permute.xlu1 %1767  ;;  %v3142_v21 = vld [vmem:[#allocation3 + $0x8] ss:$12 sps:$4 sm:$0xff]   ;;  %1964 = vmatpush1.bf16.msra.mxu0 %v2886_v18  ;;  %v1769_v26 = vrot.slane %v1766_v20, 4  ;;  %v1756_v31 = vsel %vm380_vm8, %v1750_v14, %v1755_v22 }
 0x8f5   : > { %v1770_v23 = vrot.slane %v1768_v19, 4  ;;  %1776 = vst.msk [vmem:[#allocation3 + $0x2c] sm:$0xf] %vm681_vm3, %v1768_v19  ;;  %3053 = vmatpush3.bf16.msra.mxu1 %v3142_v21 }
 0x8f6   : > { %3054 = vmatprep.subr.bf16.mxu1 %v3177_v34 }
 0x8f7   : > { %v1771_v30 = vsel %vm360_vm7, %v1769_v26, %v1770_v23  ;;  %v1782_v36 = vpop.permute.xlu0 %1781 }
 0x8f8   : > { %v1772_v33 = vsel %vm399_vm13, %v1766_v20, %v1771_v30  ;;  %v1784_v35 = vpop.permute.xlu1 %1783  ;;  %v1785_v38 = vrot.slane %v1782_v36, 4 }
 0x8f9   : > { %v1786_v37 = vrot.slane %v1784_v35, 4  ;;  %1792 = vst.msk [vmem:[#allocation3 + $0x38] sm:$0xf] %vm681_vm3, %v1784_v35  ;;  %v2890_v39 = vcombine.high %v1756_v31, %v1772_v33  ;;  %v2889_v40 = vcombine.low %v1756_v31, %v1772_v33 }
 0x8fb   : > { %1965 = vmatprep.subr.bf16.mxu0 %v2890_v39  ;;  %v1798_v43 = vpop.permute.xlu0 %1797  ;;  %v1787_v46 = vsel %vm360_vm7, %v1785_v38, %v1786_v37 }
 0x8fc   : > { %v1800_v42 = vpop.permute.xlu1 %1799  ;;  %v3143_v44 = vld [vmem:[#allocation3 + $0x20] ss:$12 sps:$4 sm:$0xff]   ;;  %1966 = vmatpush1.bf16.msra.mxu0 %v2889_v40  ;;  %v1801_v48 = vrot.slane %v1798_v43, 4  ;;  %v1788_v51 = vsel %vm416_vm9, %v1782_v36, %v1787_v46 }
 0x8fd   : > { %v1802_v47 = vrot.slane %v1800_v42, 4  ;;  %1808 = vst.msk [vmem:[#allocation3 + $0x44] sm:$0xf] %vm681_vm3, %v1800_v42  ;;  %3055 = vmatpush3.bf16.msra.mxu1 %v3143_v44 }
 0x8fe   : > { %3056 = vmatprep.subr.bf16.mxu1 %v3177_v34 }
 0x8ff   : > { %v1803_v49 = vsel %vm360_vm7, %v1801_v48, %v1802_v47  ;;  %v1814_v54 = vpop.permute.xlu0 %1813 }
 0x900   : > { %v1804_v52 = vsel %vm435_vm14, %v1798_v43, %v1803_v49  ;;  %v1816_v29 = vpop.permute.xlu1 %1815  ;;  %v1817_v32 = vrot.slane %v1814_v54, 4 }
 0x901   : > { %v1818_v56 = vrot.slane %v1816_v29, 4  ;;  %1824 = vst.msk [vmem:[#allocation3 + $0x50] sm:$0xf] %vm681_vm3, %v1816_v29  ;;  %v2893_v55 = vcombine.high %v1788_v51, %v1804_v52  ;;  %v2892_v58 = vcombine.low %v1788_v51, %v1804_v52 }
 0x903   : > { %1967 = vmatprep.subr.bf16.mxu0 %v2893_v55  ;;  %v1830_v57 = vpop.permute.xlu0 %1829  ;;  %v1819_v61 = vsel %vm360_vm7, %v1817_v32, %v1818_v56 }
 0x904   : > { %v1832_v59 = vpop.permute.xlu1 %1831  ;;  %v3144_v60 = vld [vmem:[#allocation3 + $0x38] ss:$12 sps:$4 sm:$0xff]   ;;  %1968 = vmatpush1.bf16.msra.mxu0 %v2892_v58  ;;  %v1833_v63 = vrot.slane %v1830_v57, 4  ;;  %v1820_v45 = vsel %vm452_vm10, %v1814_v54, %v1819_v61 }
 0x905   : > { %v1834_v62 = vrot.slane %v1832_v59, 4  ;;  %1840 = vst.msk [vmem:[#allocation3 + $0x5c] sm:$0xf] %vm681_vm3, %v1832_v59  ;;  %3057 = vmatpush3.bf16.msra.mxu1 %v3144_v60 }
 0x906   : > { %3058 = vmatprep.subr.bf16.mxu1 %v3177_v34 }
 0x907   : > { %v1835_v1 = vsel %vm360_vm7, %v1833_v63, %v1834_v62  ;;  %v1846_v5 = vpop.permute.xlu0 %1845 }
 0x908   : > { %v1836_v2 = vsel %vm471_vm15, %v1830_v57, %v1835_v1  ;;  %v1848_v3 = vpop.permute.xlu1 %1847  ;;  %v1849_v7 = vrot.slane %v1846_v5, 4 }
 0x909   : > { %v1850_v6 = vrot.slane %v1848_v3, 4  ;;  %1856 = vst.msk [vmem:[#allocation3 + $0x68] sm:$0xf] %vm681_vm3, %v1848_v3  ;;  %v2896_v8 = vcombine.high %v1820_v45, %v1836_v2  ;;  %v2895_v9 = vcombine.low %v1820_v45, %v1836_v2 }
 0x90b   : > { %v1851_v10 = vsel %vm360_vm7, %v1849_v7, %v1850_v6  ;;  %1969 = vmatprep.subr.bf16.mxu0 %v2896_v8 }
 0x90c   : > { %v1852_v11 = vsel %vm488_vm0, %v1846_v5, %v1851_v10  ;;  %v3145_v12 = vld [vmem:[#allocation3 + $0x50] ss:$12 sps:$4 sm:$0xff]   ;;  %1970 = vmatpush1.bf16.msra.mxu0 %v2895_v9 }
 0x90d   : > { %v2899_v13 = vcombine.high %v1852_v11, %v1852_v11  ;;  %v2898_v14 = vcombine.low %v1852_v11, %v1852_v11  ;;  %3059 = vmatpush3.bf16.msra.mxu1 %v3145_v12 }
 0x90e   : > { %3060 = vmatprep.subr.bf16.mxu1 %v3177_v34 }
 0x90f   : > { %2901 = vmatprep.subr.msk.bf16.mxu0 %vm360_vm7, %v2899_v13  ;;  %v1955_v15 = vsel %vm360_vm7, %v2898_v14, 0 }
 0x910   : > { %v3146_v16 = vld [vmem:[#allocation3 + $0x68] ss:$0 sps:$4 sm:$0xff]   ;;  %1972 = vmatpush1.bf16.msra.mxu0 %v1955_v15 }
 0x911   : > { %v1961_v18 = vsel %vm360_vm7, %v3146_v16, 0 }
 0x912   : > { %3061 = vmatpush3.bf16.msra.mxu1 %v1961_v18 }
 0x913   : > { %2902 = vmatmul.mubr.msk.bf16.vlgmr.msra.gmra.mrb[16].mxu0 %vm905_vm4, %v1857_v17  ;;  %3066 = vmatprep.subr.bf16.mxu1 %v3177_v34 }
 0x914   : > { %2345 = vmatprep.mubr.bf16.mxu0 %v3168_v0 }
 0x915   : > { %3063 = vmatmul.mubr.msk.bf16.vlgmr.msra.gmra.mrb[16].mxu1 %vm905_vm4, %v1857_v17 }
 0x916   : > { %3076 = vmatprep.mubr.msk.bf16.mxu1 %vm3179_vm6, %v3177_v34 }
 0x9e6   : > { %v1997_v19 = vpop.f32.mrb[16].mxu0 }
 0x9e7   : > { %v1998_v20 = vadd.f32 %v1997_v19, %v3491_v24  ;;  %v1999_v21 = vpop.f32.mrb[17].mxu0  ;;  %v3660_v24 = vld [vmem:[%s3832_s7] sm:$0xff] }
 0x9e8   : > { %v2000_v22 = vadd.f32 %v1999_v21, %v3496_v25  ;;  %v2001_v23 = vpop.f32.mrb[18].mxu0  ;;  %v2038_v26 = vpop.f32.mrb[16].mxu1 }
 0x9e9   : > { %v2044_v30 = vadd.f32 %v1998_v20, %v3316_v50  ;;  %v2002_v31 = vpop.f32.mrb[19].mxu0  ;;  %v2039_v33 = vadd.f32 %v2038_v26, %v3501_v27  ;;  %v3064_v36 = vpop.f32.mrb[17].mxu1  ;;  %v3666_v27 = vld [vmem:[%s3832_s7 + $0x8] sm:$0xff] }
 0x9ea   : > { %v2045_v35 = vadd.f32 %v2000_v22, %v3319_v53  ;;  %v2041_v38 = vpop.f32.mrb[18].mxu1 }
 0x9eb   : > { %v2047_v37 = vmax.f32 %v2044_v30, 0.0  ;;  %v2046_v39 = vadd.f32 %v2039_v33, %v3302_v41  ;;  %v3065_v42 = vpop.f32.mrb[19].mxu1 }
 0x9ec   : > { %v2048_v40 = vmax.f32 %v2045_v35, 0.0 }
 0x9ed   : > { %v2050_v25 = vmul.f32 %v3660_v24, %v2047_v37  ;;  %v2049_v43 = vmax.f32 %v2046_v39, 0.0 }
 0x9ee   : > { %v2051_v44 = vmul.f32 %v3666_v27, %v2048_v40 }
 0x9ef   : > { %v2052_v46 = vmul.f32 %v3584_v28, %v2049_v43 }
 0x9f0   : > { %v2956_v47 = vpack.c.bf16 %v2051_v44, %v2050_v25 }
 0x9f1   : > { %v2957_v48 = vpack.c.bf16 %v2052_v46, %v2052_v46 }
 0x9f2   : > { %2064 = vrot.lane.b32.xlu0 %v2956_v47, %s3169_s11 }
 0x9f3   : > { %2066 = vrot.lane.b32.xlu1 %v2957_v48, %s3169_s11 }
 0xa64   : > { %v2065_v49 = vpop.permute.xlu0 %2064 }
 0xa65   : > { %v2068_v51 = vrot.slane %v2065_v49, 4  ;;  %v2067_v52 = vpop.permute.xlu1 %2066 }
 0xa67   : > { %v2069_v29 = vsel %vm332_vm2, %v2068_v51, %v2065_v49  ;;  %v2070_v54 = vsel %vm332_vm2, %v2068_v51, %v2067_v52 }
 0xa68   : > { %2073 = vst.msk [vmem:[#allocation2] sm:$0xff] %vm3337_vm1, %v2069_v29 }
 0xa69   : > { %2074 = vst.msk [vmem:[#allocation2 + $0x8] sm:$0xf] %vm676_vm11, %v2070_v54 }
 0xa6f   : > { %v2079_v32 = vld [vmem:[#allocation2] sm:$0xff] }
 0xa70   : > { %v2080_v56 = vld [vmem:[#allocation2 + $0x8] sm:$0xf]  ;;  %2083 = vrot.lane.b32.xlu0 %v2079_v32, %s3174_s16 }
 0xa71   : > { %2085 = vrot.lane.b32.xlu1 %v2080_v56, %s3174_s16  ;;  %v2076_v55 = vld [vmem:[#allocation2 + $0x8] sm:$0xf] }
 0xa72   : > { %v2096_v58 = vld [vmem:[#allocation2 + $0x8] sm:$0xf]  ;;  %2078 = vst.msk [vmem:[#allocation3 + $0x8] sm:$0xf] %vm681_vm3, %v2076_v55 }
 0xa73   : > { %v2112_v59 = vld [vmem:[#allocation2 + $0x8] sm:$0xf] }
 0xa74   : > { %2099 = vrot.lane.b32.xlu0 %v2079_v32, %s3170_s12  ;;  %v2128_v57 = vld [vmem:[#allocation2 + $0x8] sm:$0xf] }
 0xa75   : > { %2101 = vrot.lane.b32.xlu1 %v2096_v58, %s3170_s12  ;;  %v2144_v60 = vld [vmem:[#allocation2 + $0x8] sm:$0xf] }
 0xa76   : > { %v2160_v61 = vld [vmem:[#allocation2 + $0x8] sm:$0xf] }
 0xa77   : > { %v2176_v62 = vld [vmem:[#allocation2 + $0x8] sm:$0xf] }
 0xa78   : > { %2115 = vrot.lane.b32.xlu0 %v2079_v32, %s3173_s15  ;;  %v2192_v63 = vld [vmem:[#allocation2 + $0x8] sm:$0xf] }
 0xa79   : > { %2117 = vrot.lane.b32.xlu1 %v2112_v59, %s3173_s15 }
 0xa7c   : > { %2131 = vrot.lane.b32.xlu0 %v2079_v32, %s3171_s13 }
 0xa7d   : > { %2133 = vrot.lane.b32.xlu1 %v2128_v57, %s3171_s13 }
 0xa80   : > { %2147 = vrot.lane.b32.xlu0 %v2079_v32, %s3175_s17 }
 0xa81   : > { %2149 = vrot.lane.b32.xlu1 %v2144_v60, %s3175_s17 }
 0xa84   : > { %2163 = vrot.lane.b32.xlu0 %v2079_v32, %s3172_s14 }
 0xa85   : > { %2165 = vrot.lane.b32.xlu1 %v2160_v61, %s3172_s14 }
 0xa88   : > { %2179 = vrot.lane.b32.xlu0 %v2079_v32, %s3176_s18 }
 0xa89   : > { %2181 = vrot.lane.b32.xlu1 %v2176_v62, %s3176_s18 }
 0xa8c   : > { %2195 = vrot.lane.b32.xlu0 %v2079_v32, %s3178_s19 }
 0xa8d   : > { %2197 = vrot.lane.b32.xlu1 %v2192_v63, %s3178_s19 }
 0xae2   : > { %v2084_v45 = vpop.permute.xlu0 %2083 }
 0xae3   : > { %v2086_v1 = vpop.permute.xlu1 %2085  ;;  %v2087_v3 = vrot.slane %v2084_v45, 4 }
 0xae4   : > { %v2088_v2 = vrot.slane %v2086_v1, 4  ;;  %2094 = vst.msk [vmem:[#allocation3 + $0x14] sm:$0xf] %vm681_vm3, %v2086_v1 }
 0xae6   : > { %v2089_v5 = vsel %vm360_vm7, %v2087_v3, %v2088_v2  ;;  %v2100_v8 = vpop.permute.xlu0 %2099 }
 0xae7   : > { %v2090_v6 = vsel %vm362_vm12, %v2084_v45, %v2089_v5  ;;  %v2102_v7 = vpop.permute.xlu1 %2101  ;;  %v2103_v10 = vrot.slane %v2100_v8, 4 }
 0xae8   : > { %v2104_v9 = vrot.slane %v2102_v7, 4  ;;  %2110 = vst.msk [vmem:[#allocation3 + $0x20] sm:$0xf] %vm681_vm3, %v2102_v7  ;;  %v2907_v11 = vcombine.high %v2079_v32, %v2090_v6  ;;  %v2906_v12 = vcombine.low %v2079_v32, %v2090_v6 }
 0xaea   : > { %2313 = vmatprep.subr.bf16.mxu0 %v2907_v11  ;;  %v2116_v14 = vpop.permute.xlu0 %2115  ;;  %v2105_v16 = vsel %vm360_vm7, %v2103_v10, %v2104_v9  ;;  %v2207_v10 = vld [vmem:[%s3828_s3] sm:$0xf] }
 0xaeb   : > { %v2118_v13 = vpop.permute.xlu1 %2117  ;;  %v3147_v15 = vld [vmem:[#allocation3 + $0x8] ss:$12 sps:$4 sm:$0xff]   ;;  %2314 = vmatpush1.bf16.msra.mxu0 %v2906_v12  ;;  %v2119_v18 = vrot.slane %v2116_v14, 4  ;;  %v2106_v20 = vsel %vm380_vm8, %v2100_v8, %v2105_v16 }
 0xaec   : > { %v2120_v17 = vrot.slane %v2118_v13, 4  ;;  %2126 = vst.msk [vmem:[#allocation3 + $0x2c] sm:$0xf] %vm681_vm3, %v2118_v13  ;;  %3067 = vmatpush3.bf16.msra.mxu1 %v3147_v15  ;;  %v2226_v12 = vld [vmem:[%s3829_s4] sm:$0xff]  ;;  %v2227_v13 = vld [vmem:[%s3829_s4 + $0x8] sm:$0xff]  ;;  %v2228_v16 = vld [vmem:[%s3829_s4 + $0x10] sm:$0xff] }
 0xaed   : > { %3068 = vmatprep.subr.bf16.mxu1 %v3177_v34 }
 0xaee   : > { %v2121_v19 = vsel %vm360_vm7, %v2119_v18, %v2120_v17  ;;  %v2132_v23 = vpop.permute.xlu0 %2131 }
 0xaef   : > { %v2122_v21 = vsel %vm399_vm13, %v2116_v14, %v2121_v19  ;;  %v2134_v22 = vpop.permute.xlu1 %2133  ;;  %v2135_v30 = vrot.slane %v2132_v23, 4 }
 0xaf0   : > { %v2136_v26 = vrot.slane %v2134_v22, 4  ;;  %2142 = vst.msk [vmem:[#allocation3 + $0x38] sm:$0xf] %vm681_vm3, %v2134_v22  ;;  %v2910_v31 = vcombine.high %v2106_v20, %v2122_v21  ;;  %v2909_v33 = vcombine.low %v2106_v20, %v2122_v21 }
 0xaf2   : > { %2315 = vmatprep.subr.bf16.mxu0 %v2910_v31  ;;  %v2148_v36 = vpop.permute.xlu0 %2147  ;;  %v2137_v38 = vsel %vm360_vm7, %v2135_v30, %v2136_v26 }
 0xaf3   : > { %v2150_v35 = vpop.permute.xlu1 %2149  ;;  %v3148_v37 = vld [vmem:[#allocation3 + $0x20] ss:$12 sps:$4 sm:$0xff]   ;;  %2316 = vmatpush1.bf16.msra.mxu0 %v2909_v33  ;;  %v2151_v40 = vrot.slane %v2148_v36, 4  ;;  %v2138_v25 = vsel %vm416_vm9, %v2132_v23, %v2137_v38 }
 0xaf4   : > { %v2152_v39 = vrot.slane %v2150_v35, 4  ;;  %2158 = vst.msk [vmem:[#allocation3 + $0x44] sm:$0xf] %vm681_vm3, %v2150_v35  ;;  %3069 = vmatpush3.bf16.msra.mxu1 %v3148_v37 }
 0xaf5   : > { %3070 = vmatprep.subr.bf16.mxu1 %v3177_v34 }
 0xaf6   : > { %v2153_v42 = vsel %vm360_vm7, %v2151_v40, %v2152_v39  ;;  %v2164_v46 = vpop.permute.xlu0 %2163 }
 0xaf7   : > { %v2154_v43 = vsel %vm435_vm14, %v2148_v36, %v2153_v42  ;;  %v2166_v44 = vpop.permute.xlu1 %2165  ;;  %v2167_v48 = vrot.slane %v2164_v46, 4 }
 0xaf8   : > { %v2168_v47 = vrot.slane %v2166_v44, 4  ;;  %2174 = vst.msk [vmem:[#allocation3 + $0x50] sm:$0xf] %vm681_vm3, %v2166_v44  ;;  %v2913_v49 = vcombine.high %v2138_v25, %v2154_v43  ;;  %v2912_v51 = vcombine.low %v2138_v25, %v2154_v43 }
 0xafa   : > { %2317 = vmatprep.subr.bf16.mxu0 %v2913_v49  ;;  %v2180_v29 = vpop.permute.xlu0 %2179  ;;  %v2169_v56 = vsel %vm360_vm7, %v2167_v48, %v2168_v47 }
 0xafb   : > { %v2182_v52 = vpop.permute.xlu1 %2181  ;;  %v3149_v54 = vld [vmem:[#allocation3 + $0x38] ss:$12 sps:$4 sm:$0xff]   ;;  %2318 = vmatpush1.bf16.msra.mxu0 %v2912_v51  ;;  %v2183_v55 = vrot.slane %v2180_v29, 4  ;;  %v2170_v59 = vsel %vm452_vm10, %v2164_v46, %v2169_v56 }
 0xafc   : > { %v2184_v32 = vrot.slane %v2182_v52, 4  ;;  %2190 = vst.msk [vmem:[#allocation3 + $0x5c] sm:$0xf] %vm681_vm3, %v2182_v52  ;;  %3071 = vmatpush3.bf16.msra.mxu1 %v3149_v54 }
 0xafd   : > { %3072 = vmatprep.subr.bf16.mxu1 %v3177_v34 }
 0xafe   : > { %v2185_v58 = vsel %vm360_vm7, %v2183_v55, %v2184_v32  ;;  %v2196_v61 = vpop.permute.xlu0 %2195 }
 0xaff   : > { %v2186_v57 = vsel %vm471_vm15, %v2180_v29, %v2185_v58  ;;  %v2198_v60 = vpop.permute.xlu1 %2197  ;;  %v2199_v63 = vrot.slane %v2196_v61, 4 }
 0xb00   : > { %v2200_v62 = vrot.slane %v2198_v60, 4  ;;  %2206 = vst.msk [vmem:[#allocation3 + $0x68] sm:$0xf] %vm681_vm3, %v2198_v60  ;;  %v2916_v1 = vcombine.high %v2170_v59, %v2186_v57  ;;  %v2915_v45 = vcombine.low %v2170_v59, %v2186_v57 }
 0xb02   : > { %v2201_v2 = vsel %vm360_vm7, %v2199_v63, %v2200_v62  ;;  %2319 = vmatprep.subr.bf16.mxu0 %v2916_v1 }
 0xb03   : > { %v2202_v3 = vsel %vm488_vm0, %v2196_v61, %v2201_v2  ;;  %v3150_v5 = vld [vmem:[#allocation3 + $0x50] ss:$12 sps:$4 sm:$0xff]   ;;  %2320 = vmatpush1.bf16.msra.mxu0 %v2915_v45 }
 0xb04   : > { %v2919_v6 = vcombine.high %v2202_v3, %v2202_v3  ;;  %v2918_v7 = vcombine.low %v2202_v3, %v2202_v3  ;;  %3073 = vmatpush3.bf16.msra.mxu1 %v3150_v5 }
 0xb05   : > { %3074 = vmatprep.subr.bf16.mxu1 %v3177_v34 }
 0xb06   : > { %2921 = vmatprep.subr.msk.bf16.mxu0 %vm360_vm7, %v2919_v6  ;;  %v2305_v8 = vsel %vm360_vm7, %v2918_v7, 0 }
 0xb07   : > { %v3151_v9 = vld [vmem:[#allocation3 + $0x68] ss:$0 sps:$4 sm:$0xff]   ;;  %2322 = vmatpush1.bf16.msra.mxu0 %v2305_v8 }
 0xb08   : > { %v2311_v11 = vsel %vm360_vm7, %v3151_v9, 0 }
 0xb09   : > { %3075 = vmatpush3.bf16.msra.mxu1 %v2311_v11 }
 0xb0a   : > { %2922 = vmatmul.mubr.msk.bf16.vlgmr.msra.gmra.mrb[20].mxu0 %vm905_vm4, %v2207_v10  ;;  %3080 = vmatprep.subr.bf16.mxu1 %v3177_v34 }
 0xb0b   : > { %2692 = vmatprep.mubr.bf16.mxu0 %v3168_v0 }
 0xb0c   : > { %3077 = vmatmul.mubr.msk.bf16.vlgmr.msra.gmra.mrb[20].mxu1 %vm905_vm4, %v2207_v10 }
 0xb0d   : > { %3090 = vmatprep.mubr.msk.bf16.mxu1 %vm3179_vm6, %v3177_v34 }
 0xbdd   : > { %v2347_v14 = vpop.f32.mrb[20].mxu0 }
 0xbde   : > { %v2348_v15 = vadd.f32 %v2347_v14, %v2226_v12  ;;  %v2349_v0 = vpop.f32.mrb[21].mxu0 }
 0xbdf   : > { %v2350_v17 = vadd.f32 %v2349_v0, %v2227_v13  ;;  %v2351_v18 = vpop.f32.mrb[22].mxu0  ;;  %v2388_v20 = vpop.f32.mrb[20].mxu1 }
 0xbe0   : > { %v2394_v19 = vmax.f32 %v2348_v15, 0.0  ;;  %v2352_v21 = vpop.f32.mrb[23].mxu0  ;;  %v2389_v22 = vadd.f32 %v2388_v20, %v2228_v16  ;;  %v3078_v26 = vpop.f32.mrb[21].mxu1 }
 0xbe1   : > { %v2395_v23 = vmax.f32 %v2350_v17, 0.0  ;;  %v2391_v31 = vpop.f32.mrb[22].mxu1 }
 0xbe2   : > { %v2397_v30 = vmul.f32 %v3660_v24, %v2394_v19  ;;  %v2396_v33 = vmax.f32 %v2389_v22, 0.0  ;;  %v3079_v36 = vpop.f32.mrb[23].mxu1 }
 0xbe3   : > { %v2398_v35 = vmul.f32 %v3666_v27, %v2395_v23 }
 0xbe4   : > { %v2399_v37 = vmul.f32 %v3584_v28, %v2396_v33 }
 0xbe5   : > { %v2958_v38 = vpack.c.bf16 %v2398_v35, %v2397_v30 }
 0xbe6   : > { %v2959_v39 = vpack.c.bf16 %v2399_v37, %v2399_v37 }
 0xbe7   : > { %2411 = vrot.lane.b32.xlu0 %v2958_v38, %s3169_s11 }
 0xbe8   : > { %2413 = vrot.lane.b32.xlu1 %v2959_v39, %s3169_s11 }
 0xc59   : > { %v2412_v40 = vpop.permute.xlu0 %2411 }
 0xc5a   : > { %v2415_v42 = vrot.slane %v2412_v40, 4  ;;  %v2414_v25 = vpop.permute.xlu1 %2413 }
 0xc5c   : > { %v2416_v43 = vsel %vm332_vm2, %v2415_v42, %v2412_v40  ;;  %v2417_v24 = vsel %vm332_vm2, %v2415_v42, %v2414_v25  ;;  %vm2746_vm2 = vcmask 261120  }
 0xc5d   : > { %2420 = vst.msk [vmem:[#allocation2] sm:$0xff] %vm3337_vm1, %v2416_v43 }
 0xc5e   : > { %2421 = vst.msk [vmem:[#allocation2 + $0x8] sm:$0xf] %vm676_vm11, %v2417_v24 }
 0xc64   : > { %v2426_v28 = vld [vmem:[#allocation2] sm:$0xff] }
 0xc65   : > { %v2427_v27 = vld [vmem:[#allocation2 + $0x8] sm:$0xf]  ;;  %2430 = vrot.lane.b32.xlu0 %v2426_v28, %s3174_s16  ;;  %2424 = vst [vmem:[#allocation3] sm:$0xff] %v2426_v28 }
 0xc66   : > { %2432 = vrot.lane.b32.xlu1 %v2427_v27, %s3174_s16  ;;  %v2423_v44 = vld [vmem:[#allocation2 + $0x8] sm:$0xf] }
 0xc67   : > { %v2443_v46 = vld [vmem:[#allocation2 + $0x8] sm:$0xf]  ;;  %2425 = vst.msk [vmem:[#allocation3 + $0x8] sm:$0xf] %vm681_vm3, %v2423_v44 }
 0xc68   : > { %v2459_v47 = vld [vmem:[#allocation2 + $0x8] sm:$0xf] }
 0xc69   : > { %2446 = vrot.lane.b32.xlu0 %v2426_v28, %s3170_s12  ;;  %v2475_v4 = vld [vmem:[#allocation2 + $0x8] sm:$0xf] }
 0xc6a   : > { %2448 = vrot.lane.b32.xlu1 %v2443_v46, %s3170_s12  ;;  %v2491_v48 = vld [vmem:[#allocation2 + $0x8] sm:$0xf] }
 0xc6b   : > { %v2507_v49 = vld [vmem:[#allocation2 + $0x8] sm:$0xf] }
 0xc6c   : > { %v2523_v51 = vld [vmem:[#allocation2 + $0x8] sm:$0xf] }
 0xc6d   : > { %2462 = vrot.lane.b32.xlu0 %v2426_v28, %s3173_s15  ;;  %v2539_v52 = vld [vmem:[#allocation2 + $0x8] sm:$0xf] }
 0xc6e   : > { %2464 = vrot.lane.b32.xlu1 %v2459_v47, %s3173_s15 }
 0xc71   : > { %2478 = vrot.lane.b32.xlu0 %v2426_v28, %s3171_s13 }
 0xc72   : > { %2480 = vrot.lane.b32.xlu1 %v2475_v4, %s3171_s13  ;;  %s3095_s13 = smul.u32 24, %s3837_s28 }
 0xc74   : > { %s305_s26 = scalar_lea.vmem %s3833_s8, %s3095_s13 }
 0xc75   : > { %2494 = vrot.lane.b32.xlu0 %v2426_v28, %s3175_s17 }
 0xc76   : > { %2496 = vrot.lane.b32.xlu1 %v2491_v48, %s3175_s17 }
 0xc79   : > { %2510 = vrot.lane.b32.xlu0 %v2426_v28, %s3172_s14 }
 0xc7a   : > { %2512 = vrot.lane.b32.xlu1 %v2507_v49, %s3172_s14 }
 0xc7d   : > { %2526 = vrot.lane.b32.xlu0 %v2426_v28, %s3176_s18 }
 0xc7e   : > { %2528 = vrot.lane.b32.xlu1 %v2523_v51, %s3176_s18 }
 0xc81   : > { %2542 = vrot.lane.b32.xlu0 %v2426_v28, %s3178_s19 }
 0xc82   : > { %2544 = vrot.lane.b32.xlu1 %v2539_v52, %s3178_s19 }
 0xcd7   : > { %v2431_v54 = vpop.permute.xlu0 %2430 }
 0xcd8   : > { %v2433_v29 = vpop.permute.xlu1 %2432  ;;  %v2434_v32 = vrot.slane %v2431_v54, 4 }
 0xcd9   : > { %v2435_v56 = vrot.slane %v2433_v29, 4  ;;  %2441 = vst.msk [vmem:[#allocation3 + $0x14] sm:$0xf] %vm681_vm3, %v2433_v29 }
 0xcdb   : > { %v2436_v55 = vsel %vm360_vm7, %v2434_v32, %v2435_v56  ;;  %v2447_v57 = vpop.permute.xlu0 %2446 }
 0xcdc   : > { %v2437_v58 = vsel %vm362_vm12, %v2431_v54, %v2436_v55  ;;  %v2449_v59 = vpop.permute.xlu1 %2448  ;;  %v2450_v61 = vrot.slane %v2447_v57, 4  ;;  %v2554_v55 = vld [vmem:[%s3830_s5] sm:$0xf] }
 0xcdd   : > { %2440 = vst [vmem:[#allocation3 + $0xc] sm:$0xff] %v2437_v58  ;;  %v2451_v60 = vrot.slane %v2449_v59, 4  ;;  %2457 = vst.msk [vmem:[#allocation3 + $0x20] sm:$0xf] %vm681_vm3, %v2449_v59  ;;  %v2926_v62 = vcombine.low %v2426_v28, %v2437_v58  ;;  %v2927_v63 = vcombine.high %v2426_v28, %v2437_v58  ;;  %v2574_v59 = vld [vmem:[%s3831_s6 + $0x8] sm:$0xff] }
 0xcdf   : > { %v2452_v1 = vsel %vm360_vm7, %v2450_v61, %v2451_v60  ;;  %2660 = vmatprep.subr.bf16.mxu0 %v2927_v63  ;;  %v2463_v3 = vpop.permute.xlu0 %2462  ;;  %v2575_v60 = vld [vmem:[%s3831_s6 + $0x10] sm:$0xff] }
 0xce0   : > { %v2453_v45 = vsel %vm380_vm8, %v2447_v57, %v2452_v1  ;;  %v2465_v2 = vpop.permute.xlu1 %2464  ;;  %v3152_v5 = vld [vmem:[#allocation3 + $0x8] ss:$12 sps:$4 sm:$0xff]   ;;  %2661 = vmatpush1.bf16.msra.mxu0 %v2926_v62  ;;  %v2466_v7 = vrot.slane %v2463_v3, 4 }
 0xce1   : > { %2456 = vst [vmem:[#allocation3 + $0x18] sm:$0xff] %v2453_v45  ;;  %v2467_v6 = vrot.slane %v2465_v2, 4  ;;  %2473 = vst.msk [vmem:[#allocation3 + $0x2c] sm:$0xf] %vm681_vm3, %v2465_v2  ;;  %3081 = vmatpush3.bf16.msra.mxu1 %v3152_v5 }
 0xce2   : > { %3082 = vmatprep.subr.bf16.mxu1 %v3177_v34 }
 0xce3   : > { %v2468_v8 = vsel %vm360_vm7, %v2466_v7, %v2467_v6  ;;  %v2479_v11 = vpop.permute.xlu0 %2478 }
 0xce4   : > { %v2469_v9 = vsel %vm399_vm13, %v2463_v3, %v2468_v8  ;;  %v2481_v10 = vpop.permute.xlu1 %2480  ;;  %v2482_v13 = vrot.slane %v2479_v11, 4 }
 0xce5   : > { %2472 = vst [vmem:[#allocation3 + $0x24] sm:$0xff] %v2469_v9  ;;  %v2483_v12 = vrot.slane %v2481_v10, 4  ;;  %2489 = vst.msk [vmem:[#allocation3 + $0x38] sm:$0xf] %vm681_vm3, %v2481_v10  ;;  %v2929_v14 = vcombine.low %v2453_v45, %v2469_v9  ;;  %v2930_v15 = vcombine.high %v2453_v45, %v2469_v9 }
 0xce7   : > { %v2484_v16 = vsel %vm360_vm7, %v2482_v13, %v2483_v12  ;;  %2662 = vmatprep.subr.bf16.mxu0 %v2930_v15  ;;  %v2495_v18 = vpop.permute.xlu0 %2494 }
 0xce8   : > { %v2485_v0 = vsel %vm416_vm9, %v2479_v11, %v2484_v16  ;;  %v2497_v17 = vpop.permute.xlu1 %2496  ;;  %v3153_v19 = vld [vmem:[#allocation3 + $0x20] ss:$12 sps:$4 sm:$0xff]   ;;  %2663 = vmatpush1.bf16.msra.mxu0 %v2929_v14  ;;  %v2498_v21 = vrot.slane %v2495_v18, 4 }
 0xce9   : > { %2488 = vst [vmem:[#allocation3 + $0x30] sm:$0xff] %v2485_v0  ;;  %v2499_v20 = vrot.slane %v2497_v17, 4  ;;  %2505 = vst.msk [vmem:[#allocation3 + $0x44] sm:$0xf] %vm681_vm3, %v2497_v17  ;;  %3083 = vmatpush3.bf16.msra.mxu1 %v3153_v19 }
 0xcea   : > { %3084 = vmatprep.subr.bf16.mxu1 %v3177_v34 }
 0xceb   : > { %v2500_v22 = vsel %vm360_vm7, %v2498_v21, %v2499_v20  ;;  %v2511_v30 = vpop.permute.xlu0 %2510 }
 0xcec   : > { %v2501_v23 = vsel %vm435_vm14, %v2495_v18, %v2500_v22  ;;  %v2513_v26 = vpop.permute.xlu1 %2512  ;;  %v2514_v33 = vrot.slane %v2511_v30, 4 }
 0xced   : > { %v2515_v31 = vrot.slane %v2513_v26, 4  ;;  %2521 = vst.msk [vmem:[#allocation3 + $0x50] sm:$0xf] %vm681_vm3, %v2513_v26  ;;  %v2932_v35 = vcombine.low %v2485_v0, %v2501_v23  ;;  %v2933_v36 = vcombine.high %v2485_v0, %v2501_v23 }
 0xcef   : > { %v2516_v37 = vsel %vm360_vm7, %v2514_v33, %v2515_v31  ;;  %2664 = vmatprep.subr.bf16.mxu0 %v2933_v36  ;;  %v2527_v40 = vpop.permute.xlu0 %2526 }
 0xcf0   : > { %v2517_v38 = vsel %vm452_vm10, %v2511_v30, %v2516_v37  ;;  %v2529_v39 = vpop.permute.xlu1 %2528  ;;  %v3154_v42 = vld [vmem:[#allocation3 + $0x38] ss:$12 sps:$4 sm:$0xff]   ;;  %2665 = vmatpush1.bf16.msra.mxu0 %v2932_v35  ;;  %v2530_v43 = vrot.slane %v2527_v40, 4 }
 0xcf1   : > { %v2531_v25 = vrot.slane %v2529_v39, 4  ;;  %2537 = vst.msk [vmem:[#allocation3 + $0x5c] sm:$0xf] %vm681_vm3, %v2529_v39  ;;  %3085 = vmatpush3.bf16.msra.mxu1 %v3154_v42 }
 0xcf2   : > { %3086 = vmatprep.subr.bf16.mxu1 %v3177_v34 }
 0xcf3   : > { %v2532_v24 = vsel %vm360_vm7, %v2530_v43, %v2531_v25  ;;  %v2543_v44 = vpop.permute.xlu0 %2542 }
 0xcf4   : > { %v2533_v27 = vsel %vm471_vm15, %v2527_v40, %v2532_v24  ;;  %v2545_v28 = vpop.permute.xlu1 %2544  ;;  %v2546_v47 = vrot.slane %v2543_v44, 4 }
 0xcf5   : > { %v2547_v46 = vrot.slane %v2545_v28, 4  ;;  %2553 = vst.msk [vmem:[#allocation3 + $0x68] sm:$0xf] %vm681_vm3, %v2545_v28  ;;  %v2935_v4 = vcombine.low %v2517_v38, %v2533_v27  ;;  %v2936_v48 = vcombine.high %v2517_v38, %v2533_v27 }
 0xcf7   : > { %v2548_v49 = vsel %vm360_vm7, %v2546_v47, %v2547_v46  ;;  %2666 = vmatprep.subr.bf16.mxu0 %v2936_v48 }
 0xcf8   : > { %v2549_v51 = vsel %vm488_vm0, %v2543_v44, %v2548_v49  ;;  %v3155_v52 = vld [vmem:[#allocation3 + $0x50] ss:$12 sps:$4 sm:$0xff]   ;;  %2667 = vmatpush1.bf16.msra.mxu0 %v2935_v4 }
 0xcf9   : > { %v2939_v29 = vcombine.high %v2549_v51, %v2549_v51  ;;  %v2938_v54 = vcombine.low %v2549_v51, %v2549_v51  ;;  %3087 = vmatpush3.bf16.msra.mxu1 %v3155_v52 }
 0xcfa   : > { %3088 = vmatprep.subr.bf16.mxu1 %v3177_v34  ;;  %v2573_v34 = vld [vmem:[%s3831_s6] sm:$0xff] }
 0xcfb   : > { %2941 = vmatprep.subr.msk.bf16.mxu0 %vm360_vm7, %v2939_v29  ;;  %v2652_v56 = vsel %vm360_vm7, %v2938_v54, 0 }
 0xcfc   : > { %v3156_v32 = vld [vmem:[#allocation3 + $0x68] ss:$0 sps:$4 sm:$0xff]   ;;  %2669 = vmatpush1.bf16.msra.mxu0 %v2652_v56 }
 0xcfd   : > { %v2658_v58 = vsel %vm360_vm7, %v3156_v32, 0 }
 0xcfe   : > { %3089 = vmatpush3.bf16.msra.mxu1 %v2658_v58 }
 0xcff   : > { %2942 = vmatmul.mubr.msk.bf16.vlgmr.msra.gmra.mrb[24].mxu0 %vm905_vm4, %v2554_v55 }
 0xd01   : > { %3091 = vmatmul.mubr.msk.bf16.vlgmr.msra.gmra.mrb[24].mxu1 %vm905_vm4, %v2554_v55 }
 0xdd2   : > { %v2694_v57 = vpop.f32.mrb[24].mxu0 }
 0xdd3   : > { %v2695_v61 = vadd.f32 %v2694_v57, %v2573_v34  ;;  %v2696_v62 = vpop.f32.mrb[25].mxu0 }
 0xdd4   : > { %v2697_v63 = vadd.f32 %v2696_v62, %v2574_v59  ;;  %v2698_v1 = vpop.f32.mrb[26].mxu0  ;;  %v2735_v45 = vpop.f32.mrb[24].mxu1 }
 0xdd5   : > { %v2741_v2 = vadd.f32 %v2695_v61, %v3316_v50  ;;  %v2699_v3 = vpop.f32.mrb[27].mxu0  ;;  %v2736_v5 = vadd.f32 %v2735_v45, %v2575_v60  ;;  %v3092_v6 = vpop.f32.mrb[25].mxu1 }
 0xdd6   : > { %v2742_v7 = vadd.f32 %v2697_v63, %v3319_v53  ;;  %v2738_v8 = vpop.f32.mrb[26].mxu1 }
 0xdd7   : > { %2744 = vst [vmem:[%s305_s26] sm:$0xff] %v2741_v2  ;;  %v2743_v9 = vadd.f32 %v2736_v5, %v3302_v41  ;;  %v3093_v10 = vpop.f32.mrb[27].mxu1 }
 0xdd8   : > { %2745 = vst [vmem:[%s305_s26 + $0x8] sm:$0xff] %v2742_v7 }
 0xdd9   : > { %2747 = vst.msk [vmem:[%s305_s26 + $0x10] sm:$0xff] %vm2746_vm2, %v2743_v9 }
 0xdda PF: > { %s18_s27 = sadd.s32 1, %s3166_s27  }
 0xddb   : > { %p15_p4 = scmp.ge.s32.totalorder %s18_s27, 4  }
 0xddd   :  { %17 = sbr.rel (!%p15_p4) target bundleno = 1 (0x1), region = 82 }

</bundles_post_ra>
